<compile_context>
chip_gen: v7x
topology: tpu7x:2x2x1
jax: 0.10.0
libtpu: 0.0.40
codegen_flags: <defaults>
</compile_context>

<pallas_src>
import jax
import jax.numpy as jnp
from jax.experimental import pallas as pl
from jax.experimental.pallas import tpu as pltpu

_H = 10          # hidden width
_LANES = 128
_SUBLANES = 8

# Flat-parameter offsets.  Concatenation order: w1,b1,w2,b2,w3,b3,w4,b4.
# Each weight is stored as (in_features, out_features) flattened row-major,
# so w[k, j] lives at  W_off + k * out_features + j.
_W1, _B1 = 0, 10          # w1: (1,10)   b1: (10,)
_W2, _B2 = 20, 120        # w2: (10,10)  b2: (10,)
_W3, _B3 = 130, 230       # w3: (10,10)  b3: (10,)
_W4, _B4 = 240, 250       # w4: (10,1)   b4: (1,)
_N_PARAMS = 251


def _tree_sum(terms):
    """Pairwise reduction: critical path depth ~log2(n) instead of n."""
    while len(terms) > 1:
        nxt = [terms[i] + terms[i + 1] for i in range(0, len(terms) - 1, 2)]
        if len(terms) % 2:
            nxt.append(terms[-1])
        terms = nxt
    return terms[0]


def _mlp_kernel(p_ref, x_ref, o_ref):
    # p_ref: (251,) f32 in SMEM (scalar path).
    # x_ref / o_ref: (8, 128) f32 VMEM blocks; each element is one sample.
    x = x_ref[...]

    # Layer 1: 1 -> 10.  One scalar-broadcast FMA + tanh (EUP) per unit.
    h = [jnp.tanh(x * p_ref[_W1 + j] + p_ref[_B1 + j]) for j in range(_H)]

    # Layers 2 and 3: 10 -> 10.  Bias folded into the k=0 FMA; 10 products
    # summed with a pairwise tree to keep the per-output chain at depth ~4.
    for w_off, b_off in ((_W2, _B2), (_W3, _B3)):
        h_new = []
        for j in range(_H):
            t = [h[0] * p_ref[w_off + j] + p_ref[b_off + j]]
            t += [h[k] * p_ref[w_off + k * _H + j] for k in range(1, _H)]
            h_new.append(jnp.tanh(_tree_sum(t)))
        h = h_new

    # Layer 4: 10 -> 1, no activation.  Bias folded into the k=0 FMA.
    t = [h[0] * p_ref[_W4] + p_ref[_B4]]
    t += [h[k] * p_ref[_W4 + k] for k in range(1, _H)]
    o_ref[...] = _tree_sum(t)


def pack_params(params):
    """Flatten + cast the 8 parameter arrays once into a single (251,) f32
    vector.  Done outside net_forward so the forward path carries no
    per-call parameter reshape/astype HLOs."""
    pieces = []
    for idx in range(1, 5):
        pieces.append(jnp.ravel(params[f"w{idx}"]).astype(jnp.float32))
        pieces.append(jnp.ravel(params[f"b{idx}"]).astype(jnp.float32))
    flat = jnp.concatenate(pieces)
    assert flat.shape == (_N_PARAMS,), flat.shape
    return flat


@jax.jit
def net_forward(x, flat_params):
    """x: (N, 1) float32.  flat_params: (251,) float32 from pack_params."""
    n = x.shape[0]
    chunk = _LANES * _SUBLANES
    n_pad = pl.cdiv(n, chunk) * chunk

    x_flat = jnp.reshape(x, (-1,))
    if n_pad != n:
        # TODO(synk): tiny (<=4 KB) pad copy; the ragged tail could instead be
        # masked in-kernel, not worth it at this problem size.
        x_flat = jnp.pad(x_flat, (0, n_pad - n))
    rows = n_pad // _LANES                      # multiple of 8 by construction
    x2 = x_flat.reshape(rows, _LANES)           # batch-on-lanes slab

    out2 = pl.pallas_call(
        _mlp_kernel,
        out_shape=jax.ShapeDtypeStruct((rows, _LANES), jnp.float32),
        grid=(rows // _SUBLANES,),
        in_specs=[
            pl.BlockSpec(memory_space=pltpu.MemorySpace.SMEM),   # flat params
            pl.BlockSpec((_SUBLANES, _LANES), lambda i: (i, 0)), # x row block
        ],
        out_specs=pl.BlockSpec((_SUBLANES, _LANES), lambda i: (i, 0)),
        compiler_params=pltpu.CompilerParams(
            dimension_semantics=("parallel",)),
    )(flat_params, x2)

    # Row-major unflatten preserves sample order; drop the padded tail.
    return out2.reshape(n_pad, 1)[:n]


def init_params(key):
    """nn.Linear-style init (uniform +/- 1/sqrt(fan_in)).

    Weights stored transposed to (in_features, out_features); biases as
    (1, out_features) so the pure-JAX reference can do `x @ w + b`.
    """
    dims = [(1, _H), (_H, _H), (_H, _H), (_H, 1)]
    params = {}
    for idx, (fan_in, fan_out) in enumerate(dims, start=1):
        key, kw, kb = jax.random.split(key, 3)
        bound = 1.0 / jnp.sqrt(jnp.float32(fan_in))
        params[f"w{idx}"] = jax.random.uniform(
            kw, (fan_in, fan_out), jnp.float32, -bound, bound)
        params[f"b{idx}"] = jax.random.uniform(
            kb, (1, fan_out), jnp.float32, -bound, bound)
    return params


def reference_forward(x, params):
    h = jnp.tanh(x @ params["w1"] + params["b1"])
    h = jnp.tanh(h @ params["w2"] + params["b2"])
    h = jnp.tanh(h @ params["w3"] + params["b3"])
    return h @ params["w4"] + params["b4"]


if __name__ == "__main__":
    key = jax.random.PRNGKey(0)
    params = init_params(key)
    flat_params = pack_params(params)          # one-time flatten/cast

    # x = torch.linspace(0, 1, 1001).unsqueeze(1)  -> (1001, 1)
    x = jnp.linspace(0.0, 1.0, 1001, dtype=jnp.float32).reshape(-1, 1)

    y = net_forward(x, flat_params)
    y = jax.block_until_ready(y)

    y_ref = reference_forward(x, params)
    assert y.shape == (1001, 1), y.shape
    assert jnp.allclose(y, y_ref, atol=1e-5, rtol=1e-5), (
        float(jnp.max(jnp.abs(y - y_ref))))

    print("KERNEL_OK")
</pallas_src>

<mosaic_0001>
module attributes {stable_mosaic.version = 11 : i64} {
  func.func @_mlp_kernel(%arg0: i32, %arg1: memref<251xf32, #tpu.memory_space<smem>>, %arg2: memref<8x128xf32, #tpu.memory_space<vmem>>, %arg3: memref<8x128xf32, #tpu.memory_space<vmem>>) attributes {dimension_semantics = [#tpu.dimension_semantics<parallel>], iteration_bounds = array<i64: 1>, scalar_prefetch = 0 : i64, scratch_operands = 0 : i64, tpu.core_type = #tpu.core_type<tc>, window_params = [{transform_indices = @transform_0, window_bounds = array<i64: 251>}, {transform_indices = @transform_1, window_bounds = array<i64: 8, 128>}, {transform_indices = @transform_2, window_bounds = array<i64: 8, 128>}]} {
    %c0 = arith.constant 0 : index
    %c0_0 = arith.constant 0 : index
    %0 = vector.load %arg2[%c0, %c0_0] : memref<8x128xf32, #tpu.memory_space<vmem>>, vector<8x128xf32>
    %c0_1 = arith.constant 0 : index
    %1 = memref.load %arg1[%c0_1] : memref<251xf32, #tpu.memory_space<smem>>
    %2 = vector.broadcast %1 : f32 to vector<8x128xf32>
    %3 = arith.mulf %0, %2 : vector<8x128xf32>
    %c10 = arith.constant 10 : index
    %4 = memref.load %arg1[%c10] : memref<251xf32, #tpu.memory_space<smem>>
    %5 = vector.broadcast %4 : f32 to vector<8x128xf32>
    %6 = arith.addf %3, %5 : vector<8x128xf32>
    %7 = math.tanh %6 : vector<8x128xf32>
    %c1 = arith.constant 1 : index
    %8 = memref.load %arg1[%c1] : memref<251xf32, #tpu.memory_space<smem>>
    %9 = vector.broadcast %8 : f32 to vector<8x128xf32>
    %10 = arith.mulf %0, %9 : vector<8x128xf32>
    %c11 = arith.constant 11 : index
    %11 = memref.load %arg1[%c11] : memref<251xf32, #tpu.memory_space<smem>>
    %12 = vector.broadcast %11 : f32 to vector<8x128xf32>
    %13 = arith.addf %10, %12 : vector<8x128xf32>
    %14 = math.tanh %13 : vector<8x128xf32>
    %c2 = arith.constant 2 : index
    %15 = memref.load %arg1[%c2] : memref<251xf32, #tpu.memory_space<smem>>
    %16 = vector.broadcast %15 : f32 to vector<8x128xf32>
    %17 = arith.mulf %0, %16 : vector<8x128xf32>
    %c12 = arith.constant 12 : index
    %18 = memref.load %arg1[%c12] : memref<251xf32, #tpu.memory_space<smem>>
    %19 = vector.broadcast %18 : f32 to vector<8x128xf32>
    %20 = arith.addf %17, %19 : vector<8x128xf32>
    %21 = math.tanh %20 : vector<8x128xf32>
    %c3 = arith.constant 3 : index
    %22 = memref.load %arg1[%c3] : memref<251xf32, #tpu.memory_space<smem>>
    %23 = vector.broadcast %22 : f32 to vector<8x128xf32>
    %24 = arith.mulf %0, %23 : vector<8x128xf32>
    %c13 = arith.constant 13 : index
    %25 = memref.load %arg1[%c13] : memref<251xf32, #tpu.memory_space<smem>>
    %26 = vector.broadcast %25 : f32 to vector<8x128xf32>
    %27 = arith.addf %24, %26 : vector<8x128xf32>
    %28 = math.tanh %27 : vector<8x128xf32>
    %c4 = arith.constant 4 : index
    %29 = memref.load %arg1[%c4] : memref<251xf32, #tpu.memory_space<smem>>
    %30 = vector.broadcast %29 : f32 to vector<8x128xf32>
    %31 = arith.mulf %0, %30 : vector<8x128xf32>
    %c14 = arith.constant 14 : index
    %32 = memref.load %arg1[%c14] : memref<251xf32, #tpu.memory_space<smem>>
    %33 = vector.broadcast %32 : f32 to vector<8x128xf32>
    %34 = arith.addf %31, %33 : vector<8x128xf32>
    %35 = math.tanh %34 : vector<8x128xf32>
    %c5 = arith.constant 5 : index
    %36 = memref.load %arg1[%c5] : memref<251xf32, #tpu.memory_space<smem>>
    %37 = vector.broadcast %36 : f32 to vector<8x128xf32>
    %38 = arith.mulf %0, %37 : vector<8x128xf32>
    %c15 = arith.constant 15 : index
    %39 = memref.load %arg1[%c15] : memref<251xf32, #tpu.memory_space<smem>>
    %40 = vector.broadcast %39 : f32 to vector<8x128xf32>
    %41 = arith.addf %38, %40 : vector<8x128xf32>
    %42 = math.tanh %41 : vector<8x128xf32>
    %c6 = arith.constant 6 : index
    %43 = memref.load %arg1[%c6] : memref<251xf32, #tpu.memory_space<smem>>
    %44 = vector.broadcast %43 : f32 to vector<8x128xf32>
    %45 = arith.mulf %0, %44 : vector<8x128xf32>
    %c16 = arith.constant 16 : index
    %46 = memref.load %arg1[%c16] : memref<251xf32, #tpu.memory_space<smem>>
    %47 = vector.broadcast %46 : f32 to vector<8x128xf32>
    %48 = arith.addf %45, %47 : vector<8x128xf32>
    %49 = math.tanh %48 : vector<8x128xf32>
    %c7 = arith.constant 7 : index
    %50 = memref.load %arg1[%c7] : memref<251xf32, #tpu.memory_space<smem>>
    %51 = vector.broadcast %50 : f32 to vector<8x128xf32>
    %52 = arith.mulf %0, %51 : vector<8x128xf32>
    %c17 = arith.constant 17 : index
    %53 = memref.load %arg1[%c17] : memref<251xf32, #tpu.memory_space<smem>>
    %54 = vector.broadcast %53 : f32 to vector<8x128xf32>
    %55 = arith.addf %52, %54 : vector<8x128xf32>
    %56 = math.tanh %55 : vector<8x128xf32>
    %c8 = arith.constant 8 : index
    %57 = memref.load %arg1[%c8] : memref<251xf32, #tpu.memory_space<smem>>
    %58 = vector.broadcast %57 : f32 to vector<8x128xf32>
    %59 = arith.mulf %0, %58 : vector<8x128xf32>
    %c18 = arith.constant 18 : index
    %60 = memref.load %arg1[%c18] : memref<251xf32, #tpu.memory_space<smem>>
    %61 = vector.broadcast %60 : f32 to vector<8x128xf32>
    %62 = arith.addf %59, %61 : vector<8x128xf32>
    %63 = math.tanh %62 : vector<8x128xf32>
    %c9 = arith.constant 9 : index
    %64 = memref.load %arg1[%c9] : memref<251xf32, #tpu.memory_space<smem>>
    %65 = vector.broadcast %64 : f32 to vector<8x128xf32>
    %66 = arith.mulf %0, %65 : vector<8x128xf32>
    %c19 = arith.constant 19 : index
    %67 = memref.load %arg1[%c19] : memref<251xf32, #tpu.memory_space<smem>>
    %68 = vector.broadcast %67 : f32 to vector<8x128xf32>
    %69 = arith.addf %66, %68 : vector<8x128xf32>
    %70 = math.tanh %69 : vector<8x128xf32>
    %c20 = arith.constant 20 : index
    %71 = memref.load %arg1[%c20] : memref<251xf32, #tpu.memory_space<smem>>
    %72 = vector.broadcast %71 : f32 to vector<8x128xf32>
    %73 = arith.mulf %7, %72 : vector<8x128xf32>
    %c120 = arith.constant 120 : index
    %74 = memref.load %arg1[%c120] : memref<251xf32, #tpu.memory_space<smem>>
    %75 = vector.broadcast %74 : f32 to vector<8x128xf32>
    %76 = arith.addf %73, %75 : vector<8x128xf32>
    %c30 = arith.constant 30 : index
    %77 = memref.load %arg1[%c30] : memref<251xf32, #tpu.memory_space<smem>>
    %78 = vector.broadcast %77 : f32 to vector<8x128xf32>
    %79 = arith.mulf %14, %78 : vector<8x128xf32>
    %c40 = arith.constant 40 : index
    %80 = memref.load %arg1[%c40] : memref<251xf32, #tpu.memory_space<smem>>
    %81 = vector.broadcast %80 : f32 to vector<8x128xf32>
    %82 = arith.mulf %21, %81 : vector<8x128xf32>
    %c50 = arith.constant 50 : index
    %83 = memref.load %arg1[%c50] : memref<251xf32, #tpu.memory_space<smem>>
    %84 = vector.broadcast %83 : f32 to vector<8x128xf32>
    %85 = arith.mulf %28, %84 : vector<8x128xf32>
    %c60 = arith.constant 60 : index
    %86 = memref.load %arg1[%c60] : memref<251xf32, #tpu.memory_space<smem>>
    %87 = vector.broadcast %86 : f32 to vector<8x128xf32>
    %88 = arith.mulf %35, %87 : vector<8x128xf32>
    %c70 = arith.constant 70 : index
    %89 = memref.load %arg1[%c70] : memref<251xf32, #tpu.memory_space<smem>>
    %90 = vector.broadcast %89 : f32 to vector<8x128xf32>
    %91 = arith.mulf %42, %90 : vector<8x128xf32>
    %c80 = arith.constant 80 : index
    %92 = memref.load %arg1[%c80] : memref<251xf32, #tpu.memory_space<smem>>
    %93 = vector.broadcast %92 : f32 to vector<8x128xf32>
    %94 = arith.mulf %49, %93 : vector<8x128xf32>
    %c90 = arith.constant 90 : index
    %95 = memref.load %arg1[%c90] : memref<251xf32, #tpu.memory_space<smem>>
    %96 = vector.broadcast %95 : f32 to vector<8x128xf32>
    %97 = arith.mulf %56, %96 : vector<8x128xf32>
    %c100 = arith.constant 100 : index
    %98 = memref.load %arg1[%c100] : memref<251xf32, #tpu.memory_space<smem>>
    %99 = vector.broadcast %98 : f32 to vector<8x128xf32>
    %100 = arith.mulf %63, %99 : vector<8x128xf32>
    %c110 = arith.constant 110 : index
    %101 = memref.load %arg1[%c110] : memref<251xf32, #tpu.memory_space<smem>>
    %102 = vector.broadcast %101 : f32 to vector<8x128xf32>
    %103 = arith.mulf %70, %102 : vector<8x128xf32>
    %104 = arith.addf %76, %79 : vector<8x128xf32>
    %105 = arith.addf %82, %85 : vector<8x128xf32>
    %106 = arith.addf %88, %91 : vector<8x128xf32>
    %107 = arith.addf %94, %97 : vector<8x128xf32>
    %108 = arith.addf %100, %103 : vector<8x128xf32>
    %109 = arith.addf %104, %105 : vector<8x128xf32>
    %110 = arith.addf %106, %107 : vector<8x128xf32>
    %111 = arith.addf %109, %110 : vector<8x128xf32>
    %112 = arith.addf %111, %108 : vector<8x128xf32>
    %113 = math.tanh %112 : vector<8x128xf32>
    %c21 = arith.constant 21 : index
    %114 = memref.load %arg1[%c21] : memref<251xf32, #tpu.memory_space<smem>>
    %115 = vector.broadcast %114 : f32 to vector<8x128xf32>
    %116 = arith.mulf %7, %115 : vector<8x128xf32>
    %c121 = arith.constant 121 : index
    %117 = memref.load %arg1[%c121] : memref<251xf32, #tpu.memory_space<smem>>
    %118 = vector.broadcast %117 : f32 to vector<8x128xf32>
    %119 = arith.addf %116, %118 : vector<8x128xf32>
    %c31 = arith.constant 31 : index
    %120 = memref.load %arg1[%c31] : memref<251xf32, #tpu.memory_space<smem>>
    %121 = vector.broadcast %120 : f32 to vector<8x128xf32>
    %122 = arith.mulf %14, %121 : vector<8x128xf32>
    %c41 = arith.constant 41 : index
    %123 = memref.load %arg1[%c41] : memref<251xf32, #tpu.memory_space<smem>>
    %124 = vector.broadcast %123 : f32 to vector<8x128xf32>
    %125 = arith.mulf %21, %124 : vector<8x128xf32>
    %c51 = arith.constant 51 : index
    %126 = memref.load %arg1[%c51] : memref<251xf32, #tpu.memory_space<smem>>
    %127 = vector.broadcast %126 : f32 to vector<8x128xf32>
    %128 = arith.mulf %28, %127 : vector<8x128xf32>
    %c61 = arith.constant 61 : index
    %129 = memref.load %arg1[%c61] : memref<251xf32, #tpu.memory_space<smem>>
    %130 = vector.broadcast %129 : f32 to vector<8x128xf32>
    %131 = arith.mulf %35, %130 : vector<8x128xf32>
    %c71 = arith.constant 71 : index
    %132 = memref.load %arg1[%c71] : memref<251xf32, #tpu.memory_space<smem>>
    %133 = vector.broadcast %132 : f32 to vector<8x128xf32>
    %134 = arith.mulf %42, %133 : vector<8x128xf32>
    %c81 = arith.constant 81 : index
    %135 = memref.load %arg1[%c81] : memref<251xf32, #tpu.memory_space<smem>>
    %136 = vector.broadcast %135 : f32 to vector<8x128xf32>
    %137 = arith.mulf %49, %136 : vector<8x128xf32>
    %c91 = arith.constant 91 : index
    %138 = memref.load %arg1[%c91] : memref<251xf32, #tpu.memory_space<smem>>
    %139 = vector.broadcast %138 : f32 to vector<8x128xf32>
    %140 = arith.mulf %56, %139 : vector<8x128xf32>
    %c101 = arith.constant 101 : index
    %141 = memref.load %arg1[%c101] : memref<251xf32, #tpu.memory_space<smem>>
    %142 = vector.broadcast %141 : f32 to vector<8x128xf32>
    %143 = arith.mulf %63, %142 : vector<8x128xf32>
    %c111 = arith.constant 111 : index
    %144 = memref.load %arg1[%c111] : memref<251xf32, #tpu.memory_space<smem>>
    %145 = vector.broadcast %144 : f32 to vector<8x128xf32>
    %146 = arith.mulf %70, %145 : vector<8x128xf32>
    %147 = arith.addf %119, %122 : vector<8x128xf32>
    %148 = arith.addf %125, %128 : vector<8x128xf32>
    %149 = arith.addf %131, %134 : vector<8x128xf32>
    %150 = arith.addf %137, %140 : vector<8x128xf32>
    %151 = arith.addf %143, %146 : vector<8x128xf32>
    %152 = arith.addf %147, %148 : vector<8x128xf32>
    %153 = arith.addf %149, %150 : vector<8x128xf32>
    %154 = arith.addf %152, %153 : vector<8x128xf32>
    %155 = arith.addf %154, %151 : vector<8x128xf32>
    %156 = math.tanh %155 : vector<8x128xf32>
    %c22 = arith.constant 22 : index
    %157 = memref.load %arg1[%c22] : memref<251xf32, #tpu.memory_space<smem>>
    %158 = vector.broadcast %157 : f32 to vector<8x128xf32>
    %159 = arith.mulf %7, %158 : vector<8x128xf32>
    %c122 = arith.constant 122 : index
    %160 = memref.load %arg1[%c122] : memref<251xf32, #tpu.memory_space<smem>>
    %161 = vector.broadcast %160 : f32 to vector<8x128xf32>
    %162 = arith.addf %159, %161 : vector<8x128xf32>
    %c32 = arith.constant 32 : index
    %163 = memref.load %arg1[%c32] : memref<251xf32, #tpu.memory_space<smem>>
    %164 = vector.broadcast %163 : f32 to vector<8x128xf32>
    %165 = arith.mulf %14, %164 : vector<8x128xf32>
    %c42 = arith.constant 42 : index
    %166 = memref.load %arg1[%c42] : memref<251xf32, #tpu.memory_space<smem>>
    %167 = vector.broadcast %166 : f32 to vector<8x128xf32>
    %168 = arith.mulf %21, %167 : vector<8x128xf32>
    %c52 = arith.constant 52 : index
    %169 = memref.load %arg1[%c52] : memref<251xf32, #tpu.memory_space<smem>>
    %170 = vector.broadcast %169 : f32 to vector<8x128xf32>
    %171 = arith.mulf %28, %170 : vector<8x128xf32>
    %c62 = arith.constant 62 : index
    %172 = memref.load %arg1[%c62] : memref<251xf32, #tpu.memory_space<smem>>
    %173 = vector.broadcast %172 : f32 to vector<8x128xf32>
    %174 = arith.mulf %35, %173 : vector<8x128xf32>
    %c72 = arith.constant 72 : index
    %175 = memref.load %arg1[%c72] : memref<251xf32, #tpu.memory_space<smem>>
    %176 = vector.broadcast %175 : f32 to vector<8x128xf32>
    %177 = arith.mulf %42, %176 : vector<8x128xf32>
    %c82 = arith.constant 82 : index
    %178 = memref.load %arg1[%c82] : memref<251xf32, #tpu.memory_space<smem>>
    %179 = vector.broadcast %178 : f32 to vector<8x128xf32>
    %180 = arith.mulf %49, %179 : vector<8x128xf32>
    %c92 = arith.constant 92 : index
    %181 = memref.load %arg1[%c92] : memref<251xf32, #tpu.memory_space<smem>>
    %182 = vector.broadcast %181 : f32 to vector<8x128xf32>
    %183 = arith.mulf %56, %182 : vector<8x128xf32>
    %c102 = arith.constant 102 : index
    %184 = memref.load %arg1[%c102] : memref<251xf32, #tpu.memory_space<smem>>
    %185 = vector.broadcast %184 : f32 to vector<8x128xf32>
    %186 = arith.mulf %63, %185 : vector<8x128xf32>
    %c112 = arith.constant 112 : index
    %187 = memref.load %arg1[%c112] : memref<251xf32, #tpu.memory_space<smem>>
    %188 = vector.broadcast %187 : f32 to vector<8x128xf32>
    %189 = arith.mulf %70, %188 : vector<8x128xf32>
    %190 = arith.addf %162, %165 : vector<8x128xf32>
    %191 = arith.addf %168, %171 : vector<8x128xf32>
    %192 = arith.addf %174, %177 : vector<8x128xf32>
    %193 = arith.addf %180, %183 : vector<8x128xf32>
    %194 = arith.addf %186, %189 : vector<8x128xf32>
    %195 = arith.addf %190, %191 : vector<8x128xf32>
    %196 = arith.addf %192, %193 : vector<8x128xf32>
    %197 = arith.addf %195, %196 : vector<8x128xf32>
    %198 = arith.addf %197, %194 : vector<8x128xf32>
    %199 = math.tanh %198 : vector<8x128xf32>
    %c23 = arith.constant 23 : index
    %200 = memref.load %arg1[%c23] : memref<251xf32, #tpu.memory_space<smem>>
    %201 = vector.broadcast %200 : f32 to vector<8x128xf32>
    %202 = arith.mulf %7, %201 : vector<8x128xf32>
    %c123 = arith.constant 123 : index
    %203 = memref.load %arg1[%c123] : memref<251xf32, #tpu.memory_space<smem>>
    %204 = vector.broadcast %203 : f32 to vector<8x128xf32>
    %205 = arith.addf %202, %204 : vector<8x128xf32>
    %c33 = arith.constant 33 : index
    %206 = memref.load %arg1[%c33] : memref<251xf32, #tpu.memory_space<smem>>
    %207 = vector.broadcast %206 : f32 to vector<8x128xf32>
    %208 = arith.mulf %14, %207 : vector<8x128xf32>
    %c43 = arith.constant 43 : index
    %209 = memref.load %arg1[%c43] : memref<251xf32, #tpu.memory_space<smem>>
    %210 = vector.broadcast %209 : f32 to vector<8x128xf32>
    %211 = arith.mulf %21, %210 : vector<8x128xf32>
    %c53 = arith.constant 53 : index
    %212 = memref.load %arg1[%c53] : memref<251xf32, #tpu.memory_space<smem>>
    %213 = vector.broadcast %212 : f32 to vector<8x128xf32>
    %214 = arith.mulf %28, %213 : vector<8x128xf32>
    %c63 = arith.constant 63 : index
    %215 = memref.load %arg1[%c63] : memref<251xf32, #tpu.memory_space<smem>>
    %216 = vector.broadcast %215 : f32 to vector<8x128xf32>
    %217 = arith.mulf %35, %216 : vector<8x128xf32>
    %c73 = arith.constant 73 : index
    %218 = memref.load %arg1[%c73] : memref<251xf32, #tpu.memory_space<smem>>
    %219 = vector.broadcast %218 : f32 to vector<8x128xf32>
    %220 = arith.mulf %42, %219 : vector<8x128xf32>
    %c83 = arith.constant 83 : index
    %221 = memref.load %arg1[%c83] : memref<251xf32, #tpu.memory_space<smem>>
    %222 = vector.broadcast %221 : f32 to vector<8x128xf32>
    %223 = arith.mulf %49, %222 : vector<8x128xf32>
    %c93 = arith.constant 93 : index
    %224 = memref.load %arg1[%c93] : memref<251xf32, #tpu.memory_space<smem>>
    %225 = vector.broadcast %224 : f32 to vector<8x128xf32>
    %226 = arith.mulf %56, %225 : vector<8x128xf32>
    %c103 = arith.constant 103 : index
    %227 = memref.load %arg1[%c103] : memref<251xf32, #tpu.memory_space<smem>>
    %228 = vector.broadcast %227 : f32 to vector<8x128xf32>
    %229 = arith.mulf %63, %228 : vector<8x128xf32>
    %c113 = arith.constant 113 : index
    %230 = memref.load %arg1[%c113] : memref<251xf32, #tpu.memory_space<smem>>
    %231 = vector.broadcast %230 : f32 to vector<8x128xf32>
    %232 = arith.mulf %70, %231 : vector<8x128xf32>
    %233 = arith.addf %205, %208 : vector<8x128xf32>
    %234 = arith.addf %211, %214 : vector<8x128xf32>
    %235 = arith.addf %217, %220 : vector<8x128xf32>
    %236 = arith.addf %223, %226 : vector<8x128xf32>
    %237 = arith.addf %229, %232 : vector<8x128xf32>
    %238 = arith.addf %233, %234 : vector<8x128xf32>
    %239 = arith.addf %235, %236 : vector<8x128xf32>
    %240 = arith.addf %238, %239 : vector<8x128xf32>
    %241 = arith.addf %240, %237 : vector<8x128xf32>
    %242 = math.tanh %241 : vector<8x128xf32>
    %c24 = arith.constant 24 : index
    %243 = memref.load %arg1[%c24] : memref<251xf32, #tpu.memory_space<smem>>
    %244 = vector.broadcast %243 : f32 to vector<8x128xf32>
    %245 = arith.mulf %7, %244 : vector<8x128xf32>
    %c124 = arith.constant 124 : index
    %246 = memref.load %arg1[%c124] : memref<251xf32, #tpu.memory_space<smem>>
    %247 = vector.broadcast %246 : f32 to vector<8x128xf32>
    %248 = arith.addf %245, %247 : vector<8x128xf32>
    %c34 = arith.constant 34 : index
    %249 = memref.load %arg1[%c34] : memref<251xf32, #tpu.memory_space<smem>>
    %250 = vector.broadcast %249 : f32 to vector<8x128xf32>
    %251 = arith.mulf %14, %250 : vector<8x128xf32>
    %c44 = arith.constant 44 : index
    %252 = memref.load %arg1[%c44] : memref<251xf32, #tpu.memory_space<smem>>
    %253 = vector.broadcast %252 : f32 to vector<8x128xf32>
    %254 = arith.mulf %21, %253 : vector<8x128xf32>
    %c54 = arith.constant 54 : index
    %255 = memref.load %arg1[%c54] : memref<251xf32, #tpu.memory_space<smem>>
    %256 = vector.broadcast %255 : f32 to vector<8x128xf32>
    %257 = arith.mulf %28, %256 : vector<8x128xf32>
    %c64 = arith.constant 64 : index
    %258 = memref.load %arg1[%c64] : memref<251xf32, #tpu.memory_space<smem>>
    %259 = vector.broadcast %258 : f32 to vector<8x128xf32>
    %260 = arith.mulf %35, %259 : vector<8x128xf32>
    %c74 = arith.constant 74 : index
    %261 = memref.load %arg1[%c74] : memref<251xf32, #tpu.memory_space<smem>>
    %262 = vector.broadcast %261 : f32 to vector<8x128xf32>
    %263 = arith.mulf %42, %262 : vector<8x128xf32>
    %c84 = arith.constant 84 : index
    %264 = memref.load %arg1[%c84] : memref<251xf32, #tpu.memory_space<smem>>
    %265 = vector.broadcast %264 : f32 to vector<8x128xf32>
    %266 = arith.mulf %49, %265 : vector<8x128xf32>
    %c94 = arith.constant 94 : index
    %267 = memref.load %arg1[%c94] : memref<251xf32, #tpu.memory_space<smem>>
    %268 = vector.broadcast %267 : f32 to vector<8x128xf32>
    %269 = arith.mulf %56, %268 : vector<8x128xf32>
    %c104 = arith.constant 104 : index
    %270 = memref.load %arg1[%c104] : memref<251xf32, #tpu.memory_space<smem>>
    %271 = vector.broadcast %270 : f32 to vector<8x128xf32>
    %272 = arith.mulf %63, %271 : vector<8x128xf32>
    %c114 = arith.constant 114 : index
    %273 = memref.load %arg1[%c114] : memref<251xf32, #tpu.memory_space<smem>>
    %274 = vector.broadcast %273 : f32 to vector<8x128xf32>
    %275 = arith.mulf %70, %274 : vector<8x128xf32>
    %276 = arith.addf %248, %251 : vector<8x128xf32>
    %277 = arith.addf %254, %257 : vector<8x128xf32>
    %278 = arith.addf %260, %263 : vector<8x128xf32>
    %279 = arith.addf %266, %269 : vector<8x128xf32>
    %280 = arith.addf %272, %275 : vector<8x128xf32>
    %281 = arith.addf %276, %277 : vector<8x128xf32>
    %282 = arith.addf %278, %279 : vector<8x128xf32>
    %283 = arith.addf %281, %282 : vector<8x128xf32>
    %284 = arith.addf %283, %280 : vector<8x128xf32>
    %285 = math.tanh %284 : vector<8x128xf32>
    %c25 = arith.constant 25 : index
    %286 = memref.load %arg1[%c25] : memref<251xf32, #tpu.memory_space<smem>>
    %287 = vector.broadcast %286 : f32 to vector<8x128xf32>
    %288 = arith.mulf %7, %287 : vector<8x128xf32>
    %c125 = arith.constant 125 : index
    %289 = memref.load %arg1[%c125] : memref<251xf32, #tpu.memory_space<smem>>
    %290 = vector.broadcast %289 : f32 to vector<8x128xf32>
    %291 = arith.addf %288, %290 : vector<8x128xf32>
    %c35 = arith.constant 35 : index
    %292 = memref.load %arg1[%c35] : memref<251xf32, #tpu.memory_space<smem>>
    %293 = vector.broadcast %292 : f32 to vector<8x128xf32>
    %294 = arith.mulf %14, %293 : vector<8x128xf32>
    %c45 = arith.constant 45 : index
    %295 = memref.load %arg1[%c45] : memref<251xf32, #tpu.memory_space<smem>>
    %296 = vector.broadcast %295 : f32 to vector<8x128xf32>
    %297 = arith.mulf %21, %296 : vector<8x128xf32>
    %c55 = arith.constant 55 : index
    %298 = memref.load %arg1[%c55] : memref<251xf32, #tpu.memory_space<smem>>
    %299 = vector.broadcast %298 : f32 to vector<8x128xf32>
    %300 = arith.mulf %28, %299 : vector<8x128xf32>
    %c65 = arith.constant 65 : index
    %301 = memref.load %arg1[%c65] : memref<251xf32, #tpu.memory_space<smem>>
    %302 = vector.broadcast %301 : f32 to vector<8x128xf32>
    %303 = arith.mulf %35, %302 : vector<8x128xf32>
    %c75 = arith.constant 75 : index
    %304 = memref.load %arg1[%c75] : memref<251xf32, #tpu.memory_space<smem>>
    %305 = vector.broadcast %304 : f32 to vector<8x128xf32>
    %306 = arith.mulf %42, %305 : vector<8x128xf32>
    %c85 = arith.constant 85 : index
    %307 = memref.load %arg1[%c85] : memref<251xf32, #tpu.memory_space<smem>>
    %308 = vector.broadcast %307 : f32 to vector<8x128xf32>
    %309 = arith.mulf %49, %308 : vector<8x128xf32>
    %c95 = arith.constant 95 : index
    %310 = memref.load %arg1[%c95] : memref<251xf32, #tpu.memory_space<smem>>
    %311 = vector.broadcast %310 : f32 to vector<8x128xf32>
    %312 = arith.mulf %56, %311 : vector<8x128xf32>
    %c105 = arith.constant 105 : index
    %313 = memref.load %arg1[%c105] : memref<251xf32, #tpu.memory_space<smem>>
    %314 = vector.broadcast %313 : f32 to vector<8x128xf32>
    %315 = arith.mulf %63, %314 : vector<8x128xf32>
    %c115 = arith.constant 115 : index
    %316 = memref.load %arg1[%c115] : memref<251xf32, #tpu.memory_space<smem>>
    %317 = vector.broadcast %316 : f32 to vector<8x128xf32>
    %318 = arith.mulf %70, %317 : vector<8x128xf32>
    %319 = arith.addf %291, %294 : vector<8x128xf32>
    %320 = arith.addf %297, %300 : vector<8x128xf32>
    %321 = arith.addf %303, %306 : vector<8x128xf32>
    %322 = arith.addf %309, %312 : vector<8x128xf32>
    %323 = arith.addf %315, %318 : vector<8x128xf32>
    %324 = arith.addf %319, %320 : vector<8x128xf32>
    %325 = arith.addf %321, %322 : vector<8x128xf32>
    %326 = arith.addf %324, %325 : vector<8x128xf32>
    %327 = arith.addf %326, %323 : vector<8x128xf32>
    %328 = math.tanh %327 : vector<8x128xf32>
    %c26 = arith.constant 26 : index
    %329 = memref.load %arg1[%c26] : memref<251xf32, #tpu.memory_space<smem>>
    %330 = vector.broadcast %329 : f32 to vector<8x128xf32>
    %331 = arith.mulf %7, %330 : vector<8x128xf32>
    %c126 = arith.constant 126 : index
    %332 = memref.load %arg1[%c126] : memref<251xf32, #tpu.memory_space<smem>>
    %333 = vector.broadcast %332 : f32 to vector<8x128xf32>
    %334 = arith.addf %331, %333 : vector<8x128xf32>
    %c36 = arith.constant 36 : index
    %335 = memref.load %arg1[%c36] : memref<251xf32, #tpu.memory_space<smem>>
    %336 = vector.broadcast %335 : f32 to vector<8x128xf32>
    %337 = arith.mulf %14, %336 : vector<8x128xf32>
    %c46 = arith.constant 46 : index
    %338 = memref.load %arg1[%c46] : memref<251xf32, #tpu.memory_space<smem>>
    %339 = vector.broadcast %338 : f32 to vector<8x128xf32>
    %340 = arith.mulf %21, %339 : vector<8x128xf32>
    %c56 = arith.constant 56 : index
    %341 = memref.load %arg1[%c56] : memref<251xf32, #tpu.memory_space<smem>>
    %342 = vector.broadcast %341 : f32 to vector<8x128xf32>
    %343 = arith.mulf %28, %342 : vector<8x128xf32>
    %c66 = arith.constant 66 : index
    %344 = memref.load %arg1[%c66] : memref<251xf32, #tpu.memory_space<smem>>
    %345 = vector.broadcast %344 : f32 to vector<8x128xf32>
    %346 = arith.mulf %35, %345 : vector<8x128xf32>
    %c76 = arith.constant 76 : index
    %347 = memref.load %arg1[%c76] : memref<251xf32, #tpu.memory_space<smem>>
    %348 = vector.broadcast %347 : f32 to vector<8x128xf32>
    %349 = arith.mulf %42, %348 : vector<8x128xf32>
    %c86 = arith.constant 86 : index
    %350 = memref.load %arg1[%c86] : memref<251xf32, #tpu.memory_space<smem>>
    %351 = vector.broadcast %350 : f32 to vector<8x128xf32>
    %352 = arith.mulf %49, %351 : vector<8x128xf32>
    %c96 = arith.constant 96 : index
    %353 = memref.load %arg1[%c96] : memref<251xf32, #tpu.memory_space<smem>>
    %354 = vector.broadcast %353 : f32 to vector<8x128xf32>
    %355 = arith.mulf %56, %354 : vector<8x128xf32>
    %c106 = arith.constant 106 : index
    %356 = memref.load %arg1[%c106] : memref<251xf32, #tpu.memory_space<smem>>
    %357 = vector.broadcast %356 : f32 to vector<8x128xf32>
    %358 = arith.mulf %63, %357 : vector<8x128xf32>
    %c116 = arith.constant 116 : index
    %359 = memref.load %arg1[%c116] : memref<251xf32, #tpu.memory_space<smem>>
    %360 = vector.broadcast %359 : f32 to vector<8x128xf32>
    %361 = arith.mulf %70, %360 : vector<8x128xf32>
    %362 = arith.addf %334, %337 : vector<8x128xf32>
    %363 = arith.addf %340, %343 : vector<8x128xf32>
    %364 = arith.addf %346, %349 : vector<8x128xf32>
    %365 = arith.addf %352, %355 : vector<8x128xf32>
    %366 = arith.addf %358, %361 : vector<8x128xf32>
    %367 = arith.addf %362, %363 : vector<8x128xf32>
    %368 = arith.addf %364, %365 : vector<8x128xf32>
    %369 = arith.addf %367, %368 : vector<8x128xf32>
    %370 = arith.addf %369, %366 : vector<8x128xf32>
    %371 = math.tanh %370 : vector<8x128xf32>
    %c27 = arith.constant 27 : index
    %372 = memref.load %arg1[%c27] : memref<251xf32, #tpu.memory_space<smem>>
    %373 = vector.broadcast %372 : f32 to vector<8x128xf32>
    %374 = arith.mulf %7, %373 : vector<8x128xf32>
    %c127 = arith.constant 127 : index
    %375 = memref.load %arg1[%c127] : memref<251xf32, #tpu.memory_space<smem>>
    %376 = vector.broadcast %375 : f32 to vector<8x128xf32>
    %377 = arith.addf %374, %376 : vector<8x128xf32>
    %c37 = arith.constant 37 : index
    %378 = memref.load %arg1[%c37] : memref<251xf32, #tpu.memory_space<smem>>
    %379 = vector.broadcast %378 : f32 to vector<8x128xf32>
    %380 = arith.mulf %14, %379 : vector<8x128xf32>
    %c47 = arith.constant 47 : index
    %381 = memref.load %arg1[%c47] : memref<251xf32, #tpu.memory_space<smem>>
    %382 = vector.broadcast %381 : f32 to vector<8x128xf32>
    %383 = arith.mulf %21, %382 : vector<8x128xf32>
    %c57 = arith.constant 57 : index
    %384 = memref.load %arg1[%c57] : memref<251xf32, #tpu.memory_space<smem>>
    %385 = vector.broadcast %384 : f32 to vector<8x128xf32>
    %386 = arith.mulf %28, %385 : vector<8x128xf32>
    %c67 = arith.constant 67 : index
    %387 = memref.load %arg1[%c67] : memref<251xf32, #tpu.memory_space<smem>>
    %388 = vector.broadcast %387 : f32 to vector<8x128xf32>
    %389 = arith.mulf %35, %388 : vector<8x128xf32>
    %c77 = arith.constant 77 : index
    %390 = memref.load %arg1[%c77] : memref<251xf32, #tpu.memory_space<smem>>
    %391 = vector.broadcast %390 : f32 to vector<8x128xf32>
    %392 = arith.mulf %42, %391 : vector<8x128xf32>
    %c87 = arith.constant 87 : index
    %393 = memref.load %arg1[%c87] : memref<251xf32, #tpu.memory_space<smem>>
    %394 = vector.broadcast %393 : f32 to vector<8x128xf32>
    %395 = arith.mulf %49, %394 : vector<8x128xf32>
    %c97 = arith.constant 97 : index
    %396 = memref.load %arg1[%c97] : memref<251xf32, #tpu.memory_space<smem>>
    %397 = vector.broadcast %396 : f32 to vector<8x128xf32>
    %398 = arith.mulf %56, %397 : vector<8x128xf32>
    %c107 = arith.constant 107 : index
    %399 = memref.load %arg1[%c107] : memref<251xf32, #tpu.memory_space<smem>>
    %400 = vector.broadcast %399 : f32 to vector<8x128xf32>
    %401 = arith.mulf %63, %400 : vector<8x128xf32>
    %c117 = arith.constant 117 : index
    %402 = memref.load %arg1[%c117] : memref<251xf32, #tpu.memory_space<smem>>
    %403 = vector.broadcast %402 : f32 to vector<8x128xf32>
    %404 = arith.mulf %70, %403 : vector<8x128xf32>
    %405 = arith.addf %377, %380 : vector<8x128xf32>
    %406 = arith.addf %383, %386 : vector<8x128xf32>
    %407 = arith.addf %389, %392 : vector<8x128xf32>
    %408 = arith.addf %395, %398 : vector<8x128xf32>
    %409 = arith.addf %401, %404 : vector<8x128xf32>
    %410 = arith.addf %405, %406 : vector<8x128xf32>
    %411 = arith.addf %407, %408 : vector<8x128xf32>
    %412 = arith.addf %410, %411 : vector<8x128xf32>
    %413 = arith.addf %412, %409 : vector<8x128xf32>
    %414 = math.tanh %413 : vector<8x128xf32>
    %c28 = arith.constant 28 : index
    %415 = memref.load %arg1[%c28] : memref<251xf32, #tpu.memory_space<smem>>
    %416 = vector.broadcast %415 : f32 to vector<8x128xf32>
    %417 = arith.mulf %7, %416 : vector<8x128xf32>
    %c128 = arith.constant 128 : index
    %418 = memref.load %arg1[%c128] : memref<251xf32, #tpu.memory_space<smem>>
    %419 = vector.broadcast %418 : f32 to vector<8x128xf32>
    %420 = arith.addf %417, %419 : vector<8x128xf32>
    %c38 = arith.constant 38 : index
    %421 = memref.load %arg1[%c38] : memref<251xf32, #tpu.memory_space<smem>>
    %422 = vector.broadcast %421 : f32 to vector<8x128xf32>
    %423 = arith.mulf %14, %422 : vector<8x128xf32>
    %c48 = arith.constant 48 : index
    %424 = memref.load %arg1[%c48] : memref<251xf32, #tpu.memory_space<smem>>
    %425 = vector.broadcast %424 : f32 to vector<8x128xf32>
    %426 = arith.mulf %21, %425 : vector<8x128xf32>
    %c58 = arith.constant 58 : index
    %427 = memref.load %arg1[%c58] : memref<251xf32, #tpu.memory_space<smem>>
    %428 = vector.broadcast %427 : f32 to vector<8x128xf32>
    %429 = arith.mulf %28, %428 : vector<8x128xf32>
    %c68 = arith.constant 68 : index
    %430 = memref.load %arg1[%c68] : memref<251xf32, #tpu.memory_space<smem>>
    %431 = vector.broadcast %430 : f32 to vector<8x128xf32>
    %432 = arith.mulf %35, %431 : vector<8x128xf32>
    %c78 = arith.constant 78 : index
    %433 = memref.load %arg1[%c78] : memref<251xf32, #tpu.memory_space<smem>>
    %434 = vector.broadcast %433 : f32 to vector<8x128xf32>
    %435 = arith.mulf %42, %434 : vector<8x128xf32>
    %c88 = arith.constant 88 : index
    %436 = memref.load %arg1[%c88] : memref<251xf32, #tpu.memory_space<smem>>
    %437 = vector.broadcast %436 : f32 to vector<8x128xf32>
    %438 = arith.mulf %49, %437 : vector<8x128xf32>
    %c98 = arith.constant 98 : index
    %439 = memref.load %arg1[%c98] : memref<251xf32, #tpu.memory_space<smem>>
    %440 = vector.broadcast %439 : f32 to vector<8x128xf32>
    %441 = arith.mulf %56, %440 : vector<8x128xf32>
    %c108 = arith.constant 108 : index
    %442 = memref.load %arg1[%c108] : memref<251xf32, #tpu.memory_space<smem>>
    %443 = vector.broadcast %442 : f32 to vector<8x128xf32>
    %444 = arith.mulf %63, %443 : vector<8x128xf32>
    %c118 = arith.constant 118 : index
    %445 = memref.load %arg1[%c118] : memref<251xf32, #tpu.memory_space<smem>>
    %446 = vector.broadcast %445 : f32 to vector<8x128xf32>
    %447 = arith.mulf %70, %446 : vector<8x128xf32>
    %448 = arith.addf %420, %423 : vector<8x128xf32>
    %449 = arith.addf %426, %429 : vector<8x128xf32>
    %450 = arith.addf %432, %435 : vector<8x128xf32>
    %451 = arith.addf %438, %441 : vector<8x128xf32>
    %452 = arith.addf %444, %447 : vector<8x128xf32>
    %453 = arith.addf %448, %449 : vector<8x128xf32>
    %454 = arith.addf %450, %451 : vector<8x128xf32>
    %455 = arith.addf %453, %454 : vector<8x128xf32>
    %456 = arith.addf %455, %452 : vector<8x128xf32>
    %457 = math.tanh %456 : vector<8x128xf32>
    %c29 = arith.constant 29 : index
    %458 = memref.load %arg1[%c29] : memref<251xf32, #tpu.memory_space<smem>>
    %459 = vector.broadcast %458 : f32 to vector<8x128xf32>
    %460 = arith.mulf %7, %459 : vector<8x128xf32>
    %c129 = arith.constant 129 : index
    %461 = memref.load %arg1[%c129] : memref<251xf32, #tpu.memory_space<smem>>
    %462 = vector.broadcast %461 : f32 to vector<8x128xf32>
    %463 = arith.addf %460, %462 : vector<8x128xf32>
    %c39 = arith.constant 39 : index
    %464 = memref.load %arg1[%c39] : memref<251xf32, #tpu.memory_space<smem>>
    %465 = vector.broadcast %464 : f32 to vector<8x128xf32>
    %466 = arith.mulf %14, %465 : vector<8x128xf32>
    %c49 = arith.constant 49 : index
    %467 = memref.load %arg1[%c49] : memref<251xf32, #tpu.memory_space<smem>>
    %468 = vector.broadcast %467 : f32 to vector<8x128xf32>
    %469 = arith.mulf %21, %468 : vector<8x128xf32>
    %c59 = arith.constant 59 : index
    %470 = memref.load %arg1[%c59] : memref<251xf32, #tpu.memory_space<smem>>
    %471 = vector.broadcast %470 : f32 to vector<8x128xf32>
    %472 = arith.mulf %28, %471 : vector<8x128xf32>
    %c69 = arith.constant 69 : index
    %473 = memref.load %arg1[%c69] : memref<251xf32, #tpu.memory_space<smem>>
    %474 = vector.broadcast %473 : f32 to vector<8x128xf32>
    %475 = arith.mulf %35, %474 : vector<8x128xf32>
    %c79 = arith.constant 79 : index
    %476 = memref.load %arg1[%c79] : memref<251xf32, #tpu.memory_space<smem>>
    %477 = vector.broadcast %476 : f32 to vector<8x128xf32>
    %478 = arith.mulf %42, %477 : vector<8x128xf32>
    %c89 = arith.constant 89 : index
    %479 = memref.load %arg1[%c89] : memref<251xf32, #tpu.memory_space<smem>>
    %480 = vector.broadcast %479 : f32 to vector<8x128xf32>
    %481 = arith.mulf %49, %480 : vector<8x128xf32>
    %c99 = arith.constant 99 : index
    %482 = memref.load %arg1[%c99] : memref<251xf32, #tpu.memory_space<smem>>
    %483 = vector.broadcast %482 : f32 to vector<8x128xf32>
    %484 = arith.mulf %56, %483 : vector<8x128xf32>
    %c109 = arith.constant 109 : index
    %485 = memref.load %arg1[%c109] : memref<251xf32, #tpu.memory_space<smem>>
    %486 = vector.broadcast %485 : f32 to vector<8x128xf32>
    %487 = arith.mulf %63, %486 : vector<8x128xf32>
    %c119 = arith.constant 119 : index
    %488 = memref.load %arg1[%c119] : memref<251xf32, #tpu.memory_space<smem>>
    %489 = vector.broadcast %488 : f32 to vector<8x128xf32>
    %490 = arith.mulf %70, %489 : vector<8x128xf32>
    %491 = arith.addf %463, %466 : vector<8x128xf32>
    %492 = arith.addf %469, %472 : vector<8x128xf32>
    %493 = arith.addf %475, %478 : vector<8x128xf32>
    %494 = arith.addf %481, %484 : vector<8x128xf32>
    %495 = arith.addf %487, %490 : vector<8x128xf32>
    %496 = arith.addf %491, %492 : vector<8x128xf32>
    %497 = arith.addf %493, %494 : vector<8x128xf32>
    %498 = arith.addf %496, %497 : vector<8x128xf32>
    %499 = arith.addf %498, %495 : vector<8x128xf32>
    %500 = math.tanh %499 : vector<8x128xf32>
    %c130 = arith.constant 130 : index
    %501 = memref.load %arg1[%c130] : memref<251xf32, #tpu.memory_space<smem>>
    %502 = vector.broadcast %501 : f32 to vector<8x128xf32>
    %503 = arith.mulf %113, %502 : vector<8x128xf32>
    %c230 = arith.constant 230 : index
    %504 = memref.load %arg1[%c230] : memref<251xf32, #tpu.memory_space<smem>>
    %505 = vector.broadcast %504 : f32 to vector<8x128xf32>
    %506 = arith.addf %503, %505 : vector<8x128xf32>
    %c140 = arith.constant 140 : index
    %507 = memref.load %arg1[%c140] : memref<251xf32, #tpu.memory_space<smem>>
    %508 = vector.broadcast %507 : f32 to vector<8x128xf32>
    %509 = arith.mulf %156, %508 : vector<8x128xf32>
    %c150 = arith.constant 150 : index
    %510 = memref.load %arg1[%c150] : memref<251xf32, #tpu.memory_space<smem>>
    %511 = vector.broadcast %510 : f32 to vector<8x128xf32>
    %512 = arith.mulf %199, %511 : vector<8x128xf32>
    %c160 = arith.constant 160 : index
    %513 = memref.load %arg1[%c160] : memref<251xf32, #tpu.memory_space<smem>>
    %514 = vector.broadcast %513 : f32 to vector<8x128xf32>
    %515 = arith.mulf %242, %514 : vector<8x128xf32>
    %c170 = arith.constant 170 : index
    %516 = memref.load %arg1[%c170] : memref<251xf32, #tpu.memory_space<smem>>
    %517 = vector.broadcast %516 : f32 to vector<8x128xf32>
    %518 = arith.mulf %285, %517 : vector<8x128xf32>
    %c180 = arith.constant 180 : index
    %519 = memref.load %arg1[%c180] : memref<251xf32, #tpu.memory_space<smem>>
    %520 = vector.broadcast %519 : f32 to vector<8x128xf32>
    %521 = arith.mulf %328, %520 : vector<8x128xf32>
    %c190 = arith.constant 190 : index
    %522 = memref.load %arg1[%c190] : memref<251xf32, #tpu.memory_space<smem>>
    %523 = vector.broadcast %522 : f32 to vector<8x128xf32>
    %524 = arith.mulf %371, %523 : vector<8x128xf32>
    %c200 = arith.constant 200 : index
    %525 = memref.load %arg1[%c200] : memref<251xf32, #tpu.memory_space<smem>>
    %526 = vector.broadcast %525 : f32 to vector<8x128xf32>
    %527 = arith.mulf %414, %526 : vector<8x128xf32>
    %c210 = arith.constant 210 : index
    %528 = memref.load %arg1[%c210] : memref<251xf32, #tpu.memory_space<smem>>
    %529 = vector.broadcast %528 : f32 to vector<8x128xf32>
    %530 = arith.mulf %457, %529 : vector<8x128xf32>
    %c220 = arith.constant 220 : index
    %531 = memref.load %arg1[%c220] : memref<251xf32, #tpu.memory_space<smem>>
    %532 = vector.broadcast %531 : f32 to vector<8x128xf32>
    %533 = arith.mulf %500, %532 : vector<8x128xf32>
    %534 = arith.addf %506, %509 : vector<8x128xf32>
    %535 = arith.addf %512, %515 : vector<8x128xf32>
    %536 = arith.addf %518, %521 : vector<8x128xf32>
    %537 = arith.addf %524, %527 : vector<8x128xf32>
    %538 = arith.addf %530, %533 : vector<8x128xf32>
    %539 = arith.addf %534, %535 : vector<8x128xf32>
    %540 = arith.addf %536, %537 : vector<8x128xf32>
    %541 = arith.addf %539, %540 : vector<8x128xf32>
    %542 = arith.addf %541, %538 : vector<8x128xf32>
    %543 = math.tanh %542 : vector<8x128xf32>
    %c131 = arith.constant 131 : index
    %544 = memref.load %arg1[%c131] : memref<251xf32, #tpu.memory_space<smem>>
    %545 = vector.broadcast %544 : f32 to vector<8x128xf32>
    %546 = arith.mulf %113, %545 : vector<8x128xf32>
    %c231 = arith.constant 231 : index
    %547 = memref.load %arg1[%c231] : memref<251xf32, #tpu.memory_space<smem>>
    %548 = vector.broadcast %547 : f32 to vector<8x128xf32>
    %549 = arith.addf %546, %548 : vector<8x128xf32>
    %c141 = arith.constant 141 : index
    %550 = memref.load %arg1[%c141] : memref<251xf32, #tpu.memory_space<smem>>
    %551 = vector.broadcast %550 : f32 to vector<8x128xf32>
    %552 = arith.mulf %156, %551 : vector<8x128xf32>
    %c151 = arith.constant 151 : index
    %553 = memref.load %arg1[%c151] : memref<251xf32, #tpu.memory_space<smem>>
    %554 = vector.broadcast %553 : f32 to vector<8x128xf32>
    %555 = arith.mulf %199, %554 : vector<8x128xf32>
    %c161 = arith.constant 161 : index
    %556 = memref.load %arg1[%c161] : memref<251xf32, #tpu.memory_space<smem>>
    %557 = vector.broadcast %556 : f32 to vector<8x128xf32>
    %558 = arith.mulf %242, %557 : vector<8x128xf32>
    %c171 = arith.constant 171 : index
    %559 = memref.load %arg1[%c171] : memref<251xf32, #tpu.memory_space<smem>>
    %560 = vector.broadcast %559 : f32 to vector<8x128xf32>
    %561 = arith.mulf %285, %560 : vector<8x128xf32>
    %c181 = arith.constant 181 : index
    %562 = memref.load %arg1[%c181] : memref<251xf32, #tpu.memory_space<smem>>
    %563 = vector.broadcast %562 : f32 to vector<8x128xf32>
    %564 = arith.mulf %328, %563 : vector<8x128xf32>
    %c191 = arith.constant 191 : index
    %565 = memref.load %arg1[%c191] : memref<251xf32, #tpu.memory_space<smem>>
    %566 = vector.broadcast %565 : f32 to vector<8x128xf32>
    %567 = arith.mulf %371, %566 : vector<8x128xf32>
    %c201 = arith.constant 201 : index
    %568 = memref.load %arg1[%c201] : memref<251xf32, #tpu.memory_space<smem>>
    %569 = vector.broadcast %568 : f32 to vector<8x128xf32>
    %570 = arith.mulf %414, %569 : vector<8x128xf32>
    %c211 = arith.constant 211 : index
    %571 = memref.load %arg1[%c211] : memref<251xf32, #tpu.memory_space<smem>>
    %572 = vector.broadcast %571 : f32 to vector<8x128xf32>
    %573 = arith.mulf %457, %572 : vector<8x128xf32>
    %c221 = arith.constant 221 : index
    %574 = memref.load %arg1[%c221] : memref<251xf32, #tpu.memory_space<smem>>
    %575 = vector.broadcast %574 : f32 to vector<8x128xf32>
    %576 = arith.mulf %500, %575 : vector<8x128xf32>
    %577 = arith.addf %549, %552 : vector<8x128xf32>
    %578 = arith.addf %555, %558 : vector<8x128xf32>
    %579 = arith.addf %561, %564 : vector<8x128xf32>
    %580 = arith.addf %567, %570 : vector<8x128xf32>
    %581 = arith.addf %573, %576 : vector<8x128xf32>
    %582 = arith.addf %577, %578 : vector<8x128xf32>
    %583 = arith.addf %579, %580 : vector<8x128xf32>
    %584 = arith.addf %582, %583 : vector<8x128xf32>
    %585 = arith.addf %584, %581 : vector<8x128xf32>
    %586 = math.tanh %585 : vector<8x128xf32>
    %c132 = arith.constant 132 : index
    %587 = memref.load %arg1[%c132] : memref<251xf32, #tpu.memory_space<smem>>
    %588 = vector.broadcast %587 : f32 to vector<8x128xf32>
    %589 = arith.mulf %113, %588 : vector<8x128xf32>
    %c232 = arith.constant 232 : index
    %590 = memref.load %arg1[%c232] : memref<251xf32, #tpu.memory_space<smem>>
    %591 = vector.broadcast %590 : f32 to vector<8x128xf32>
    %592 = arith.addf %589, %591 : vector<8x128xf32>
    %c142 = arith.constant 142 : index
    %593 = memref.load %arg1[%c142] : memref<251xf32, #tpu.memory_space<smem>>
    %594 = vector.broadcast %593 : f32 to vector<8x128xf32>
    %595 = arith.mulf %156, %594 : vector<8x128xf32>
    %c152 = arith.constant 152 : index
    %596 = memref.load %arg1[%c152] : memref<251xf32, #tpu.memory_space<smem>>
    %597 = vector.broadcast %596 : f32 to vector<8x128xf32>
    %598 = arith.mulf %199, %597 : vector<8x128xf32>
    %c162 = arith.constant 162 : index
    %599 = memref.load %arg1[%c162] : memref<251xf32, #tpu.memory_space<smem>>
    %600 = vector.broadcast %599 : f32 to vector<8x128xf32>
    %601 = arith.mulf %242, %600 : vector<8x128xf32>
    %c172 = arith.constant 172 : index
    %602 = memref.load %arg1[%c172] : memref<251xf32, #tpu.memory_space<smem>>
    %603 = vector.broadcast %602 : f32 to vector<8x128xf32>
    %604 = arith.mulf %285, %603 : vector<8x128xf32>
    %c182 = arith.constant 182 : index
    %605 = memref.load %arg1[%c182] : memref<251xf32, #tpu.memory_space<smem>>
    %606 = vector.broadcast %605 : f32 to vector<8x128xf32>
    %607 = arith.mulf %328, %606 : vector<8x128xf32>
    %c192 = arith.constant 192 : index
    %608 = memref.load %arg1[%c192] : memref<251xf32, #tpu.memory_space<smem>>
    %609 = vector.broadcast %608 : f32 to vector<8x128xf32>
    %610 = arith.mulf %371, %609 : vector<8x128xf32>
    %c202 = arith.constant 202 : index
    %611 = memref.load %arg1[%c202] : memref<251xf32, #tpu.memory_space<smem>>
    %612 = vector.broadcast %611 : f32 to vector<8x128xf32>
    %613 = arith.mulf %414, %612 : vector<8x128xf32>
    %c212 = arith.constant 212 : index
    %614 = memref.load %arg1[%c212] : memref<251xf32, #tpu.memory_space<smem>>
    %615 = vector.broadcast %614 : f32 to vector<8x128xf32>
    %616 = arith.mulf %457, %615 : vector<8x128xf32>
    %c222 = arith.constant 222 : index
    %617 = memref.load %arg1[%c222] : memref<251xf32, #tpu.memory_space<smem>>
    %618 = vector.broadcast %617 : f32 to vector<8x128xf32>
    %619 = arith.mulf %500, %618 : vector<8x128xf32>
    %620 = arith.addf %592, %595 : vector<8x128xf32>
    %621 = arith.addf %598, %601 : vector<8x128xf32>
    %622 = arith.addf %604, %607 : vector<8x128xf32>
    %623 = arith.addf %610, %613 : vector<8x128xf32>
    %624 = arith.addf %616, %619 : vector<8x128xf32>
    %625 = arith.addf %620, %621 : vector<8x128xf32>
    %626 = arith.addf %622, %623 : vector<8x128xf32>
    %627 = arith.addf %625, %626 : vector<8x128xf32>
    %628 = arith.addf %627, %624 : vector<8x128xf32>
    %629 = math.tanh %628 : vector<8x128xf32>
    %c133 = arith.constant 133 : index
    %630 = memref.load %arg1[%c133] : memref<251xf32, #tpu.memory_space<smem>>
    %631 = vector.broadcast %630 : f32 to vector<8x128xf32>
    %632 = arith.mulf %113, %631 : vector<8x128xf32>
    %c233 = arith.constant 233 : index
    %633 = memref.load %arg1[%c233] : memref<251xf32, #tpu.memory_space<smem>>
    %634 = vector.broadcast %633 : f32 to vector<8x128xf32>
    %635 = arith.addf %632, %634 : vector<8x128xf32>
    %c143 = arith.constant 143 : index
    %636 = memref.load %arg1[%c143] : memref<251xf32, #tpu.memory_space<smem>>
    %637 = vector.broadcast %636 : f32 to vector<8x128xf32>
    %638 = arith.mulf %156, %637 : vector<8x128xf32>
    %c153 = arith.constant 153 : index
    %639 = memref.load %arg1[%c153] : memref<251xf32, #tpu.memory_space<smem>>
    %640 = vector.broadcast %639 : f32 to vector<8x128xf32>
    %641 = arith.mulf %199, %640 : vector<8x128xf32>
    %c163 = arith.constant 163 : index
    %642 = memref.load %arg1[%c163] : memref<251xf32, #tpu.memory_space<smem>>
    %643 = vector.broadcast %642 : f32 to vector<8x128xf32>
    %644 = arith.mulf %242, %643 : vector<8x128xf32>
    %c173 = arith.constant 173 : index
    %645 = memref.load %arg1[%c173] : memref<251xf32, #tpu.memory_space<smem>>
    %646 = vector.broadcast %645 : f32 to vector<8x128xf32>
    %647 = arith.mulf %285, %646 : vector<8x128xf32>
    %c183 = arith.constant 183 : index
    %648 = memref.load %arg1[%c183] : memref<251xf32, #tpu.memory_space<smem>>
    %649 = vector.broadcast %648 : f32 to vector<8x128xf32>
    %650 = arith.mulf %328, %649 : vector<8x128xf32>
    %c193 = arith.constant 193 : index
    %651 = memref.load %arg1[%c193] : memref<251xf32, #tpu.memory_space<smem>>
    %652 = vector.broadcast %651 : f32 to vector<8x128xf32>
    %653 = arith.mulf %371, %652 : vector<8x128xf32>
    %c203 = arith.constant 203 : index
    %654 = memref.load %arg1[%c203] : memref<251xf32, #tpu.memory_space<smem>>
    %655 = vector.broadcast %654 : f32 to vector<8x128xf32>
    %656 = arith.mulf %414, %655 : vector<8x128xf32>
    %c213 = arith.constant 213 : index
    %657 = memref.load %arg1[%c213] : memref<251xf32, #tpu.memory_space<smem>>
    %658 = vector.broadcast %657 : f32 to vector<8x128xf32>
    %659 = arith.mulf %457, %658 : vector<8x128xf32>
    %c223 = arith.constant 223 : index
    %660 = memref.load %arg1[%c223] : memref<251xf32, #tpu.memory_space<smem>>
    %661 = vector.broadcast %660 : f32 to vector<8x128xf32>
    %662 = arith.mulf %500, %661 : vector<8x128xf32>
    %663 = arith.addf %635, %638 : vector<8x128xf32>
    %664 = arith.addf %641, %644 : vector<8x128xf32>
    %665 = arith.addf %647, %650 : vector<8x128xf32>
    %666 = arith.addf %653, %656 : vector<8x128xf32>
    %667 = arith.addf %659, %662 : vector<8x128xf32>
    %668 = arith.addf %663, %664 : vector<8x128xf32>
    %669 = arith.addf %665, %666 : vector<8x128xf32>
    %670 = arith.addf %668, %669 : vector<8x128xf32>
    %671 = arith.addf %670, %667 : vector<8x128xf32>
    %672 = math.tanh %671 : vector<8x128xf32>
    %c134 = arith.constant 134 : index
    %673 = memref.load %arg1[%c134] : memref<251xf32, #tpu.memory_space<smem>>
    %674 = vector.broadcast %673 : f32 to vector<8x128xf32>
    %675 = arith.mulf %113, %674 : vector<8x128xf32>
    %c234 = arith.constant 234 : index
    %676 = memref.load %arg1[%c234] : memref<251xf32, #tpu.memory_space<smem>>
    %677 = vector.broadcast %676 : f32 to vector<8x128xf32>
    %678 = arith.addf %675, %677 : vector<8x128xf32>
    %c144 = arith.constant 144 : index
    %679 = memref.load %arg1[%c144] : memref<251xf32, #tpu.memory_space<smem>>
    %680 = vector.broadcast %679 : f32 to vector<8x128xf32>
    %681 = arith.mulf %156, %680 : vector<8x128xf32>
    %c154 = arith.constant 154 : index
    %682 = memref.load %arg1[%c154] : memref<251xf32, #tpu.memory_space<smem>>
    %683 = vector.broadcast %682 : f32 to vector<8x128xf32>
    %684 = arith.mulf %199, %683 : vector<8x128xf32>
    %c164 = arith.constant 164 : index
    %685 = memref.load %arg1[%c164] : memref<251xf32, #tpu.memory_space<smem>>
    %686 = vector.broadcast %685 : f32 to vector<8x128xf32>
    %687 = arith.mulf %242, %686 : vector<8x128xf32>
    %c174 = arith.constant 174 : index
    %688 = memref.load %arg1[%c174] : memref<251xf32, #tpu.memory_space<smem>>
    %689 = vector.broadcast %688 : f32 to vector<8x128xf32>
    %690 = arith.mulf %285, %689 : vector<8x128xf32>
    %c184 = arith.constant 184 : index
    %691 = memref.load %arg1[%c184] : memref<251xf32, #tpu.memory_space<smem>>
    %692 = vector.broadcast %691 : f32 to vector<8x128xf32>
    %693 = arith.mulf %328, %692 : vector<8x128xf32>
    %c194 = arith.constant 194 : index
    %694 = memref.load %arg1[%c194] : memref<251xf32, #tpu.memory_space<smem>>
    %695 = vector.broadcast %694 : f32 to vector<8x128xf32>
    %696 = arith.mulf %371, %695 : vector<8x128xf32>
    %c204 = arith.constant 204 : index
    %697 = memref.load %arg1[%c204] : memref<251xf32, #tpu.memory_space<smem>>
    %698 = vector.broadcast %697 : f32 to vector<8x128xf32>
    %699 = arith.mulf %414, %698 : vector<8x128xf32>
    %c214 = arith.constant 214 : index
    %700 = memref.load %arg1[%c214] : memref<251xf32, #tpu.memory_space<smem>>
    %701 = vector.broadcast %700 : f32 to vector<8x128xf32>
    %702 = arith.mulf %457, %701 : vector<8x128xf32>
    %c224 = arith.constant 224 : index
    %703 = memref.load %arg1[%c224] : memref<251xf32, #tpu.memory_space<smem>>
    %704 = vector.broadcast %703 : f32 to vector<8x128xf32>
    %705 = arith.mulf %500, %704 : vector<8x128xf32>
    %706 = arith.addf %678, %681 : vector<8x128xf32>
    %707 = arith.addf %684, %687 : vector<8x128xf32>
    %708 = arith.addf %690, %693 : vector<8x128xf32>
    %709 = arith.addf %696, %699 : vector<8x128xf32>
    %710 = arith.addf %702, %705 : vector<8x128xf32>
    %711 = arith.addf %706, %707 : vector<8x128xf32>
    %712 = arith.addf %708, %709 : vector<8x128xf32>
    %713 = arith.addf %711, %712 : vector<8x128xf32>
    %714 = arith.addf %713, %710 : vector<8x128xf32>
    %715 = math.tanh %714 : vector<8x128xf32>
    %c135 = arith.constant 135 : index
    %716 = memref.load %arg1[%c135] : memref<251xf32, #tpu.memory_space<smem>>
    %717 = vector.broadcast %716 : f32 to vector<8x128xf32>
    %718 = arith.mulf %113, %717 : vector<8x128xf32>
    %c235 = arith.constant 235 : index
    %719 = memref.load %arg1[%c235] : memref<251xf32, #tpu.memory_space<smem>>
    %720 = vector.broadcast %719 : f32 to vector<8x128xf32>
    %721 = arith.addf %718, %720 : vector<8x128xf32>
    %c145 = arith.constant 145 : index
    %722 = memref.load %arg1[%c145] : memref<251xf32, #tpu.memory_space<smem>>
    %723 = vector.broadcast %722 : f32 to vector<8x128xf32>
    %724 = arith.mulf %156, %723 : vector<8x128xf32>
    %c155 = arith.constant 155 : index
    %725 = memref.load %arg1[%c155] : memref<251xf32, #tpu.memory_space<smem>>
    %726 = vector.broadcast %725 : f32 to vector<8x128xf32>
    %727 = arith.mulf %199, %726 : vector<8x128xf32>
    %c165 = arith.constant 165 : index
    %728 = memref.load %arg1[%c165] : memref<251xf32, #tpu.memory_space<smem>>
    %729 = vector.broadcast %728 : f32 to vector<8x128xf32>
    %730 = arith.mulf %242, %729 : vector<8x128xf32>
    %c175 = arith.constant 175 : index
    %731 = memref.load %arg1[%c175] : memref<251xf32, #tpu.memory_space<smem>>
    %732 = vector.broadcast %731 : f32 to vector<8x128xf32>
    %733 = arith.mulf %285, %732 : vector<8x128xf32>
    %c185 = arith.constant 185 : index
    %734 = memref.load %arg1[%c185] : memref<251xf32, #tpu.memory_space<smem>>
    %735 = vector.broadcast %734 : f32 to vector<8x128xf32>
    %736 = arith.mulf %328, %735 : vector<8x128xf32>
    %c195 = arith.constant 195 : index
    %737 = memref.load %arg1[%c195] : memref<251xf32, #tpu.memory_space<smem>>
    %738 = vector.broadcast %737 : f32 to vector<8x128xf32>
    %739 = arith.mulf %371, %738 : vector<8x128xf32>
    %c205 = arith.constant 205 : index
    %740 = memref.load %arg1[%c205] : memref<251xf32, #tpu.memory_space<smem>>
    %741 = vector.broadcast %740 : f32 to vector<8x128xf32>
    %742 = arith.mulf %414, %741 : vector<8x128xf32>
    %c215 = arith.constant 215 : index
    %743 = memref.load %arg1[%c215] : memref<251xf32, #tpu.memory_space<smem>>
    %744 = vector.broadcast %743 : f32 to vector<8x128xf32>
    %745 = arith.mulf %457, %744 : vector<8x128xf32>
    %c225 = arith.constant 225 : index
    %746 = memref.load %arg1[%c225] : memref<251xf32, #tpu.memory_space<smem>>
    %747 = vector.broadcast %746 : f32 to vector<8x128xf32>
    %748 = arith.mulf %500, %747 : vector<8x128xf32>
    %749 = arith.addf %721, %724 : vector<8x128xf32>
    %750 = arith.addf %727, %730 : vector<8x128xf32>
    %751 = arith.addf %733, %736 : vector<8x128xf32>
    %752 = arith.addf %739, %742 : vector<8x128xf32>
    %753 = arith.addf %745, %748 : vector<8x128xf32>
    %754 = arith.addf %749, %750 : vector<8x128xf32>
    %755 = arith.addf %751, %752 : vector<8x128xf32>
    %756 = arith.addf %754, %755 : vector<8x128xf32>
    %757 = arith.addf %756, %753 : vector<8x128xf32>
    %758 = math.tanh %757 : vector<8x128xf32>
    %c136 = arith.constant 136 : index
    %759 = memref.load %arg1[%c136] : memref<251xf32, #tpu.memory_space<smem>>
    %760 = vector.broadcast %759 : f32 to vector<8x128xf32>
    %761 = arith.mulf %113, %760 : vector<8x128xf32>
    %c236 = arith.constant 236 : index
    %762 = memref.load %arg1[%c236] : memref<251xf32, #tpu.memory_space<smem>>
    %763 = vector.broadcast %762 : f32 to vector<8x128xf32>
    %764 = arith.addf %761, %763 : vector<8x128xf32>
    %c146 = arith.constant 146 : index
    %765 = memref.load %arg1[%c146] : memref<251xf32, #tpu.memory_space<smem>>
    %766 = vector.broadcast %765 : f32 to vector<8x128xf32>
    %767 = arith.mulf %156, %766 : vector<8x128xf32>
    %c156 = arith.constant 156 : index
    %768 = memref.load %arg1[%c156] : memref<251xf32, #tpu.memory_space<smem>>
    %769 = vector.broadcast %768 : f32 to vector<8x128xf32>
    %770 = arith.mulf %199, %769 : vector<8x128xf32>
    %c166 = arith.constant 166 : index
    %771 = memref.load %arg1[%c166] : memref<251xf32, #tpu.memory_space<smem>>
    %772 = vector.broadcast %771 : f32 to vector<8x128xf32>
    %773 = arith.mulf %242, %772 : vector<8x128xf32>
    %c176 = arith.constant 176 : index
    %774 = memref.load %arg1[%c176] : memref<251xf32, #tpu.memory_space<smem>>
    %775 = vector.broadcast %774 : f32 to vector<8x128xf32>
    %776 = arith.mulf %285, %775 : vector<8x128xf32>
    %c186 = arith.constant 186 : index
    %777 = memref.load %arg1[%c186] : memref<251xf32, #tpu.memory_space<smem>>
    %778 = vector.broadcast %777 : f32 to vector<8x128xf32>
    %779 = arith.mulf %328, %778 : vector<8x128xf32>
    %c196 = arith.constant 196 : index
    %780 = memref.load %arg1[%c196] : memref<251xf32, #tpu.memory_space<smem>>
    %781 = vector.broadcast %780 : f32 to vector<8x128xf32>
    %782 = arith.mulf %371, %781 : vector<8x128xf32>
    %c206 = arith.constant 206 : index
    %783 = memref.load %arg1[%c206] : memref<251xf32, #tpu.memory_space<smem>>
    %784 = vector.broadcast %783 : f32 to vector<8x128xf32>
    %785 = arith.mulf %414, %784 : vector<8x128xf32>
    %c216 = arith.constant 216 : index
    %786 = memref.load %arg1[%c216] : memref<251xf32, #tpu.memory_space<smem>>
    %787 = vector.broadcast %786 : f32 to vector<8x128xf32>
    %788 = arith.mulf %457, %787 : vector<8x128xf32>
    %c226 = arith.constant 226 : index
    %789 = memref.load %arg1[%c226] : memref<251xf32, #tpu.memory_space<smem>>
    %790 = vector.broadcast %789 : f32 to vector<8x128xf32>
    %791 = arith.mulf %500, %790 : vector<8x128xf32>
    %792 = arith.addf %764, %767 : vector<8x128xf32>
    %793 = arith.addf %770, %773 : vector<8x128xf32>
    %794 = arith.addf %776, %779 : vector<8x128xf32>
    %795 = arith.addf %782, %785 : vector<8x128xf32>
    %796 = arith.addf %788, %791 : vector<8x128xf32>
    %797 = arith.addf %792, %793 : vector<8x128xf32>
    %798 = arith.addf %794, %795 : vector<8x128xf32>
    %799 = arith.addf %797, %798 : vector<8x128xf32>
    %800 = arith.addf %799, %796 : vector<8x128xf32>
    %801 = math.tanh %800 : vector<8x128xf32>
    %c137 = arith.constant 137 : index
    %802 = memref.load %arg1[%c137] : memref<251xf32, #tpu.memory_space<smem>>
    %803 = vector.broadcast %802 : f32 to vector<8x128xf32>
    %804 = arith.mulf %113, %803 : vector<8x128xf32>
    %c237 = arith.constant 237 : index
    %805 = memref.load %arg1[%c237] : memref<251xf32, #tpu.memory_space<smem>>
    %806 = vector.broadcast %805 : f32 to vector<8x128xf32>
    %807 = arith.addf %804, %806 : vector<8x128xf32>
    %c147 = arith.constant 147 : index
    %808 = memref.load %arg1[%c147] : memref<251xf32, #tpu.memory_space<smem>>
    %809 = vector.broadcast %808 : f32 to vector<8x128xf32>
    %810 = arith.mulf %156, %809 : vector<8x128xf32>
    %c157 = arith.constant 157 : index
    %811 = memref.load %arg1[%c157] : memref<251xf32, #tpu.memory_space<smem>>
    %812 = vector.broadcast %811 : f32 to vector<8x128xf32>
    %813 = arith.mulf %199, %812 : vector<8x128xf32>
    %c167 = arith.constant 167 : index
    %814 = memref.load %arg1[%c167] : memref<251xf32, #tpu.memory_space<smem>>
    %815 = vector.broadcast %814 : f32 to vector<8x128xf32>
    %816 = arith.mulf %242, %815 : vector<8x128xf32>
    %c177 = arith.constant 177 : index
    %817 = memref.load %arg1[%c177] : memref<251xf32, #tpu.memory_space<smem>>
    %818 = vector.broadcast %817 : f32 to vector<8x128xf32>
    %819 = arith.mulf %285, %818 : vector<8x128xf32>
    %c187 = arith.constant 187 : index
    %820 = memref.load %arg1[%c187] : memref<251xf32, #tpu.memory_space<smem>>
    %821 = vector.broadcast %820 : f32 to vector<8x128xf32>
    %822 = arith.mulf %328, %821 : vector<8x128xf32>
    %c197 = arith.constant 197 : index
    %823 = memref.load %arg1[%c197] : memref<251xf32, #tpu.memory_space<smem>>
    %824 = vector.broadcast %823 : f32 to vector<8x128xf32>
    %825 = arith.mulf %371, %824 : vector<8x128xf32>
    %c207 = arith.constant 207 : index
    %826 = memref.load %arg1[%c207] : memref<251xf32, #tpu.memory_space<smem>>
    %827 = vector.broadcast %826 : f32 to vector<8x128xf32>
    %828 = arith.mulf %414, %827 : vector<8x128xf32>
    %c217 = arith.constant 217 : index
    %829 = memref.load %arg1[%c217] : memref<251xf32, #tpu.memory_space<smem>>
    %830 = vector.broadcast %829 : f32 to vector<8x128xf32>
    %831 = arith.mulf %457, %830 : vector<8x128xf32>
    %c227 = arith.constant 227 : index
    %832 = memref.load %arg1[%c227] : memref<251xf32, #tpu.memory_space<smem>>
    %833 = vector.broadcast %832 : f32 to vector<8x128xf32>
    %834 = arith.mulf %500, %833 : vector<8x128xf32>
    %835 = arith.addf %807, %810 : vector<8x128xf32>
    %836 = arith.addf %813, %816 : vector<8x128xf32>
    %837 = arith.addf %819, %822 : vector<8x128xf32>
    %838 = arith.addf %825, %828 : vector<8x128xf32>
    %839 = arith.addf %831, %834 : vector<8x128xf32>
    %840 = arith.addf %835, %836 : vector<8x128xf32>
    %841 = arith.addf %837, %838 : vector<8x128xf32>
    %842 = arith.addf %840, %841 : vector<8x128xf32>
    %843 = arith.addf %842, %839 : vector<8x128xf32>
    %844 = math.tanh %843 : vector<8x128xf32>
    %c138 = arith.constant 138 : index
    %845 = memref.load %arg1[%c138] : memref<251xf32, #tpu.memory_space<smem>>
    %846 = vector.broadcast %845 : f32 to vector<8x128xf32>
    %847 = arith.mulf %113, %846 : vector<8x128xf32>
    %c238 = arith.constant 238 : index
    %848 = memref.load %arg1[%c238] : memref<251xf32, #tpu.memory_space<smem>>
    %849 = vector.broadcast %848 : f32 to vector<8x128xf32>
    %850 = arith.addf %847, %849 : vector<8x128xf32>
    %c148 = arith.constant 148 : index
    %851 = memref.load %arg1[%c148] : memref<251xf32, #tpu.memory_space<smem>>
    %852 = vector.broadcast %851 : f32 to vector<8x128xf32>
    %853 = arith.mulf %156, %852 : vector<8x128xf32>
    %c158 = arith.constant 158 : index
    %854 = memref.load %arg1[%c158] : memref<251xf32, #tpu.memory_space<smem>>
    %855 = vector.broadcast %854 : f32 to vector<8x128xf32>
    %856 = arith.mulf %199, %855 : vector<8x128xf32>
    %c168 = arith.constant 168 : index
    %857 = memref.load %arg1[%c168] : memref<251xf32, #tpu.memory_space<smem>>
    %858 = vector.broadcast %857 : f32 to vector<8x128xf32>
    %859 = arith.mulf %242, %858 : vector<8x128xf32>
    %c178 = arith.constant 178 : index
    %860 = memref.load %arg1[%c178] : memref<251xf32, #tpu.memory_space<smem>>
    %861 = vector.broadcast %860 : f32 to vector<8x128xf32>
    %862 = arith.mulf %285, %861 : vector<8x128xf32>
    %c188 = arith.constant 188 : index
    %863 = memref.load %arg1[%c188] : memref<251xf32, #tpu.memory_space<smem>>
    %864 = vector.broadcast %863 : f32 to vector<8x128xf32>
    %865 = arith.mulf %328, %864 : vector<8x128xf32>
    %c198 = arith.constant 198 : index
    %866 = memref.load %arg1[%c198] : memref<251xf32, #tpu.memory_space<smem>>
    %867 = vector.broadcast %866 : f32 to vector<8x128xf32>
    %868 = arith.mulf %371, %867 : vector<8x128xf32>
    %c208 = arith.constant 208 : index
    %869 = memref.load %arg1[%c208] : memref<251xf32, #tpu.memory_space<smem>>
    %870 = vector.broadcast %869 : f32 to vector<8x128xf32>
    %871 = arith.mulf %414, %870 : vector<8x128xf32>
    %c218 = arith.constant 218 : index
    %872 = memref.load %arg1[%c218] : memref<251xf32, #tpu.memory_space<smem>>
    %873 = vector.broadcast %872 : f32 to vector<8x128xf32>
    %874 = arith.mulf %457, %873 : vector<8x128xf32>
    %c228 = arith.constant 228 : index
    %875 = memref.load %arg1[%c228] : memref<251xf32, #tpu.memory_space<smem>>
    %876 = vector.broadcast %875 : f32 to vector<8x128xf32>
    %877 = arith.mulf %500, %876 : vector<8x128xf32>
    %878 = arith.addf %850, %853 : vector<8x128xf32>
    %879 = arith.addf %856, %859 : vector<8x128xf32>
    %880 = arith.addf %862, %865 : vector<8x128xf32>
    %881 = arith.addf %868, %871 : vector<8x128xf32>
    %882 = arith.addf %874, %877 : vector<8x128xf32>
    %883 = arith.addf %878, %879 : vector<8x128xf32>
    %884 = arith.addf %880, %881 : vector<8x128xf32>
    %885 = arith.addf %883, %884 : vector<8x128xf32>
    %886 = arith.addf %885, %882 : vector<8x128xf32>
    %887 = math.tanh %886 : vector<8x128xf32>
    %c139 = arith.constant 139 : index
    %888 = memref.load %arg1[%c139] : memref<251xf32, #tpu.memory_space<smem>>
    %889 = vector.broadcast %888 : f32 to vector<8x128xf32>
    %890 = arith.mulf %113, %889 : vector<8x128xf32>
    %c239 = arith.constant 239 : index
    %891 = memref.load %arg1[%c239] : memref<251xf32, #tpu.memory_space<smem>>
    %892 = vector.broadcast %891 : f32 to vector<8x128xf32>
    %893 = arith.addf %890, %892 : vector<8x128xf32>
    %c149 = arith.constant 149 : index
    %894 = memref.load %arg1[%c149] : memref<251xf32, #tpu.memory_space<smem>>
    %895 = vector.broadcast %894 : f32 to vector<8x128xf32>
    %896 = arith.mulf %156, %895 : vector<8x128xf32>
    %c159 = arith.constant 159 : index
    %897 = memref.load %arg1[%c159] : memref<251xf32, #tpu.memory_space<smem>>
    %898 = vector.broadcast %897 : f32 to vector<8x128xf32>
    %899 = arith.mulf %199, %898 : vector<8x128xf32>
    %c169 = arith.constant 169 : index
    %900 = memref.load %arg1[%c169] : memref<251xf32, #tpu.memory_space<smem>>
    %901 = vector.broadcast %900 : f32 to vector<8x128xf32>
    %902 = arith.mulf %242, %901 : vector<8x128xf32>
    %c179 = arith.constant 179 : index
    %903 = memref.load %arg1[%c179] : memref<251xf32, #tpu.memory_space<smem>>
    %904 = vector.broadcast %903 : f32 to vector<8x128xf32>
    %905 = arith.mulf %285, %904 : vector<8x128xf32>
    %c189 = arith.constant 189 : index
    %906 = memref.load %arg1[%c189] : memref<251xf32, #tpu.memory_space<smem>>
    %907 = vector.broadcast %906 : f32 to vector<8x128xf32>
    %908 = arith.mulf %328, %907 : vector<8x128xf32>
    %c199 = arith.constant 199 : index
    %909 = memref.load %arg1[%c199] : memref<251xf32, #tpu.memory_space<smem>>
    %910 = vector.broadcast %909 : f32 to vector<8x128xf32>
    %911 = arith.mulf %371, %910 : vector<8x128xf32>
    %c209 = arith.constant 209 : index
    %912 = memref.load %arg1[%c209] : memref<251xf32, #tpu.memory_space<smem>>
    %913 = vector.broadcast %912 : f32 to vector<8x128xf32>
    %914 = arith.mulf %414, %913 : vector<8x128xf32>
    %c219 = arith.constant 219 : index
    %915 = memref.load %arg1[%c219] : memref<251xf32, #tpu.memory_space<smem>>
    %916 = vector.broadcast %915 : f32 to vector<8x128xf32>
    %917 = arith.mulf %457, %916 : vector<8x128xf32>
    %c229 = arith.constant 229 : index
    %918 = memref.load %arg1[%c229] : memref<251xf32, #tpu.memory_space<smem>>
    %919 = vector.broadcast %918 : f32 to vector<8x128xf32>
    %920 = arith.mulf %500, %919 : vector<8x128xf32>
    %921 = arith.addf %893, %896 : vector<8x128xf32>
    %922 = arith.addf %899, %902 : vector<8x128xf32>
    %923 = arith.addf %905, %908 : vector<8x128xf32>
    %924 = arith.addf %911, %914 : vector<8x128xf32>
    %925 = arith.addf %917, %920 : vector<8x128xf32>
    %926 = arith.addf %921, %922 : vector<8x128xf32>
    %927 = arith.addf %923, %924 : vector<8x128xf32>
    %928 = arith.addf %926, %927 : vector<8x128xf32>
    %929 = arith.addf %928, %925 : vector<8x128xf32>
    %930 = math.tanh %929 : vector<8x128xf32>
    %c240 = arith.constant 240 : index
    %931 = memref.load %arg1[%c240] : memref<251xf32, #tpu.memory_space<smem>>
    %932 = vector.broadcast %931 : f32 to vector<8x128xf32>
    %933 = arith.mulf %543, %932 : vector<8x128xf32>
    %c250 = arith.constant 250 : index
    %934 = memref.load %arg1[%c250] : memref<251xf32, #tpu.memory_space<smem>>
    %935 = vector.broadcast %934 : f32 to vector<8x128xf32>
    %936 = arith.addf %933, %935 : vector<8x128xf32>
    %c241 = arith.constant 241 : index
    %937 = memref.load %arg1[%c241] : memref<251xf32, #tpu.memory_space<smem>>
    %938 = vector.broadcast %937 : f32 to vector<8x128xf32>
    %939 = arith.mulf %586, %938 : vector<8x128xf32>
    %c242 = arith.constant 242 : index
    %940 = memref.load %arg1[%c242] : memref<251xf32, #tpu.memory_space<smem>>
    %941 = vector.broadcast %940 : f32 to vector<8x128xf32>
    %942 = arith.mulf %629, %941 : vector<8x128xf32>
    %c243 = arith.constant 243 : index
    %943 = memref.load %arg1[%c243] : memref<251xf32, #tpu.memory_space<smem>>
    %944 = vector.broadcast %943 : f32 to vector<8x128xf32>
    %945 = arith.mulf %672, %944 : vector<8x128xf32>
    %c244 = arith.constant 244 : index
    %946 = memref.load %arg1[%c244] : memref<251xf32, #tpu.memory_space<smem>>
    %947 = vector.broadcast %946 : f32 to vector<8x128xf32>
    %948 = arith.mulf %715, %947 : vector<8x128xf32>
    %c245 = arith.constant 245 : index
    %949 = memref.load %arg1[%c245] : memref<251xf32, #tpu.memory_space<smem>>
    %950 = vector.broadcast %949 : f32 to vector<8x128xf32>
    %951 = arith.mulf %758, %950 : vector<8x128xf32>
    %c246 = arith.constant 246 : index
    %952 = memref.load %arg1[%c246] : memref<251xf32, #tpu.memory_space<smem>>
    %953 = vector.broadcast %952 : f32 to vector<8x128xf32>
    %954 = arith.mulf %801, %953 : vector<8x128xf32>
    %c247 = arith.constant 247 : index
    %955 = memref.load %arg1[%c247] : memref<251xf32, #tpu.memory_space<smem>>
    %956 = vector.broadcast %955 : f32 to vector<8x128xf32>
    %957 = arith.mulf %844, %956 : vector<8x128xf32>
    %c248 = arith.constant 248 : index
    %958 = memref.load %arg1[%c248] : memref<251xf32, #tpu.memory_space<smem>>
    %959 = vector.broadcast %958 : f32 to vector<8x128xf32>
    %960 = arith.mulf %887, %959 : vector<8x128xf32>
    %c249 = arith.constant 249 : index
    %961 = memref.load %arg1[%c249] : memref<251xf32, #tpu.memory_space<smem>>
    %962 = vector.broadcast %961 : f32 to vector<8x128xf32>
    %963 = arith.mulf %930, %962 : vector<8x128xf32>
    %964 = arith.addf %936, %939 : vector<8x128xf32>
    %965 = arith.addf %942, %945 : vector<8x128xf32>
    %966 = arith.addf %948, %951 : vector<8x128xf32>
    %967 = arith.addf %954, %957 : vector<8x128xf32>
    %968 = arith.addf %960, %963 : vector<8x128xf32>
    %969 = arith.addf %964, %965 : vector<8x128xf32>
    %970 = arith.addf %966, %967 : vector<8x128xf32>
    %971 = arith.addf %969, %970 : vector<8x128xf32>
    %972 = arith.addf %971, %968 : vector<8x128xf32>
    %c0_2 = arith.constant 0 : index
    %c0_3 = arith.constant 0 : index
    %973 = vector.load %arg3[%c0_2, %c0_3] : memref<8x128xf32, #tpu.memory_space<vmem>>, vector<8x128xf32>
    tpu.vector_store %arg3[%c0_2, %c0_3], %972 {strides = array<i32>} : memref<8x128xf32, #tpu.memory_space<vmem>>, vector<8x128xf32>,
    return
  }
  func.func @transform_0(%arg0: i32) -> i32 {
    %c0_i32 = arith.constant 0 : i32
    %c0_i32_0 = arith.constant 0 : i32
    return %c0_i32 : i32
  }
  func.func @transform_1(%arg0: i32) -> (i32, i32) {
    %c0_i32 = arith.constant 0 : i32
    %c0_i32_0 = arith.constant 0 : i32
    return %arg0, %c0_i32 : i32, i32
  }
  func.func @transform_2(%arg0: i32) -> (i32, i32) {
    %c0_i32 = arith.constant 0 : i32
    %c0_i32_0 = arith.constant 0 : i32
    return %arg0, %c0_i32 : i32, i32
  }
}

</mosaic_0001>

<bundles_post_ra>
// kernel: net_forward.1
= control target key start
LH: loop header
LB: loop body
LE: loop exit
PB: predicated region body
PF: predicated region fallthrough
CT: control target
= control target key end

     0   :  { %7 = vsyncpa [#allocation4], 0  ;;  %s2402_s0 = inlined_call_operand.vmem [shape: f32[251], index: 0, kind: input, shape index: {}]   ;;  %s2403_s1 = inlined_call_operand.vmem [shape: f32[8,128], index: 1, kind: input, shape index: {}]   ;;  %s2404_s2 = inlined_call_operand.hbm [shape: f32[8,128], index: 2, kind: output, shape index: {}]  }
   0x1   :  { %8 = vsyncpa [#allocation3], 0  ;;  %s15_s11 = sshll.u32 %s2402_s0, 4  ;;  %s16_s11 = int_to_ptr.vmem [resolvable:$true] %s15_s11 }
   0x2   :  { %s1326_s12 = scalar_lea.vmem %s16_s11, 32  ;;  %p1331_p1 = scmp.lt.s32.totalorder %s16_s11, %s16_s11 }
   0x3   :  { %p1327_p0 = scmp.ne.s32.totalorder %s16_s11, %s1326_s12  ;;  %p1332_p2 = scmp.lt.s32.totalorder %s1326_s12, %s1326_s12 }
   0x5   :  { %p1333_p3 = por %p1332_p2, %p1331_p1 }
   0x7   :  { %p1334_p4 = pnand %p1333_p3, %p1327_p0 }
   0x9   :  { %1337 = shalt.err (!%p1334_p4)
}
   0xa   :  { %s1364_s13 = smov [#allocation2]  }
   0xb   :  { %18 = dma.vmem_to_smem %s16_s11, 32, %s1364_s13, [#allocation4]  }
   0xc   :  { %1360 = dma.done.wait [#allocation4], 32  }
   0xd   :  { %1361 = vsyncadd [#allocation4], 4294967264 }
   0xe   :  { %24 = sfence }
   0xf   :  { %s26_s14 = sld [smem:[#allocation2]]  ;;  %s1014_s15 = sld [smem:[#allocation2 + $0xa]]  ;;  %v1391_v0 = vld [vmem:[%s2403_s1] sm:$0xff] }
  0x10   :  { %s1015_s16 = sld [smem:[#allocation2 + $0x1]]  ;;  %s1016_s17 = sld [smem:[#allocation2 + $0xb]] }
  0x11   :  { %s1017_s18 = sld [smem:[#allocation2 + $0x2]]  ;;  %s1384_s19 = sld [smem:[#allocation2 + $0xc]] }
  0x12   :  { %s1019_s0 = sld [smem:[#allocation2 + $0x3]]  ;;  %s1386_s20 = sld [smem:[#allocation2 + $0xd]] }
  0x13   :  { %s1393_s23 = sld [smem:[#allocation2 + $0x4]]  ;;  %s1395_s24 = sld [smem:[#allocation2 + $0xe]] }
  0x14   :  { %s1397_s25 = sld [smem:[#allocation2 + $0x5]]  ;;  %s1399_s26 = sld [smem:[#allocation2 + $0xf]] }
  0x15   :  { %v27_v1 = vstv %s26_s14  ;;  %v30_v2 = vstv %s1014_s15  ;;  %s1401_s27 = sld [smem:[#allocation2 + $0x6]]  ;;  %s1403_s28 = sld [smem:[#allocation2 + $0x10]] }
  0x16   :  { %v28_v3 = vmul.f32 %v27_v1, %v1391_v0  ;;  %v34_v4 = vstv %s1015_s16  ;;  %v37_v5 = vstv %s1016_s17  ;;  %s1406_s1 = sld [smem:[#allocation2 + $0x7]]  ;;  %s1408_s29 = sld [smem:[#allocation2 + $0x11]] }
  0x17   :  { %v35_v6 = vmul.f32 %v34_v4, %v1391_v0  ;;  %v41_v7 = vstv %s1017_s18  ;;  %v44_v8 = vstv %s1384_s19  ;;  %s1412_s30 = sld [smem:[#allocation2 + $0x8]]  ;;  %s1414_s3 = sld [smem:[#allocation2 + $0x12]] }
  0x18   :  { %v31_v9 = vadd.f32 %v30_v2, %v28_v3  ;;  %v42_v10 = vmul.f32 %v41_v7, %v1391_v0  ;;  %v48_v11 = vstv %s1019_s0  ;;  %v51_v12 = vstv %s1386_s20  ;;  %s1418_s4 = sld [smem:[#allocation2 + $0x9]]  ;;  %s1420_s5 = sld [smem:[#allocation2 + $0x13]] }
  0x19   :  { %v38_v13 = vadd.f32 %v37_v5, %v35_v6  ;;  %v49_v14 = vmul.f32 %v48_v11, %v1391_v0  ;;  %v55_v15 = vstv %s1393_s23  ;;  %v58_v16 = vstv %s1395_s24  ;;  %s1425_s6 = sld [smem:[#allocation2 + $0x14]]  ;;  %s1427_s7 = sld [smem:[#allocation2 + $0x78]] }
  0x1a   :  { %1266 = vtanh.f32 %v31_v9  ;;  %v45_v17 = vadd.f32 %v44_v8, %v42_v10  ;;  %v56_v18 = vmul.f32 %v55_v15, %v1391_v0  ;;  %v62_v19 = vstv %s1397_s25  ;;  %s1431_s8 = sld [smem:[#allocation2 + $0x1e]]  ;;  %s1433_s9 = sld [smem:[#allocation2 + $0x28]] }
  0x1b   :  { %1268 = vtanh.f32 %v38_v13  ;;  %v52_v20 = vadd.f32 %v51_v12, %v49_v14  ;;  %v63_v21 = vmul.f32 %v62_v19, %v1391_v0  ;;  %v65_v22 = vstv %s1399_s26  ;;  %s1437_s10 = sld [smem:[#allocation2 + $0x32]]  ;;  %s1439_s11 = sld [smem:[#allocation2 + $0x3c]] }
  0x1c   :  { %1270 = vtanh.f32 %v45_v17  ;;  %v59_v23 = vadd.f32 %v58_v16, %v56_v18  ;;  %v69_v24 = vstv %s1401_s27  ;;  %v72_v25 = vstv %s1403_s28  ;;  %s1443_s12 = sld [smem:[#allocation2 + $0x46]]  ;;  %s1445_s13 = sld [smem:[#allocation2 + $0x50]] }
  0x1d   :  { %1272 = vtanh.f32 %v52_v20  ;;  %v66_v26 = vadd.f32 %v65_v22, %v63_v21  ;;  %v70_v27 = vmul.f32 %v69_v24, %v1391_v0  ;;  %v76_v28 = vstv %s1406_s1  ;;  %s1449_s14 = sld [smem:[#allocation2 + $0x5a]]  ;;  %s1451_s15 = sld [smem:[#allocation2 + $0x64]] }
  0x1e   :  { %1274 = vtanh.f32 %v59_v23  ;;  %v77_v29 = vmul.f32 %v76_v28, %v1391_v0  ;;  %v79_v30 = vstv %s1408_s29  ;;  %v83_v31 = vstv %s1412_s30  ;;  %s1456_s16 = sld [smem:[#allocation2 + $0x6e]]  ;;  %s1458_s17 = sld [smem:[#allocation2 + $0x15]] }
  0x1f   :  { %1276 = vtanh.f32 %v66_v26  ;;  %v73_v32 = vadd.f32 %v72_v25, %v70_v27  ;;  %v84_v33 = vmul.f32 %v83_v31, %v1391_v0  ;;  %v86_v34 = vstv %s1414_s3  ;;  %s1462_s18 = sld [smem:[#allocation2 + $0x79]]  ;;  %s1464_s19 = sld [smem:[#allocation2 + $0x1f]] }
  0x20   :  { %v80_v35 = vadd.f32 %v79_v30, %v77_v29  ;;  %v90_v36 = vstv %s1418_s4  ;;  %v93_v37 = vstv %s1420_s5  ;;  %v97_v38 = vstv %s1425_s6  ;;  %s1469_s0 = sld [smem:[#allocation2 + $0x29]]  ;;  %s1471_s20 = sld [smem:[#allocation2 + $0x33]] }
  0x21   :  { %1278 = vtanh.f32 %v73_v32  ;;  %v87_v39 = vadd.f32 %v86_v34, %v84_v33  ;;  %v91_v40 = vmul.f32 %v90_v36, %v1391_v0  ;;  %v100_v41 = vstv %s1427_s7  ;;  %s1475_s21 = sld [smem:[#allocation2 + $0x3d]]  ;;  %s1477_s22 = sld [smem:[#allocation2 + $0x47]] }
  0x22   :  { %1280 = vtanh.f32 %v80_v35  ;;  %v103_v42 = vstv %s1431_s8  ;;  %v106_v43 = vstv %s1433_s9  ;;  %v109_v44 = vstv %s1437_s10  ;;  %s1482_s23 = sld [smem:[#allocation2 + $0x51]]  ;;  %s1484_s24 = sld [smem:[#allocation2 + $0x5b]] }
  0x23   :  { %1282 = vtanh.f32 %v87_v39  ;;  %v94_v45 = vadd.f32 %v93_v37, %v91_v40  ;;  %v112_v46 = vstv %s1439_s11  ;;  %v115_v47 = vstv %s1443_s12  ;;  %s1488_s25 = sld [smem:[#allocation2 + $0x65]]  ;;  %s1490_s26 = sld [smem:[#allocation2 + $0x6f]] }
  0x24   :  { %v1492_v48 = vpop.eup %1266  ;;  %v118_v49 = vstv %s1445_s13  ;;  %v121_v50 = vstv %s1449_s14  ;;  %v124_v51 = vstv %s1451_s15  ;;  %v127_v52 = vstv %s1456_s16  ;;  %s1509_s27 = sld [smem:[#allocation2 + $0x16]]  ;;  %s1521_s28 = sld [smem:[#allocation2 + $0x7a]] }
  0x25   :  { %v1498_v53 = vpop.eup %1268  ;;  %1284 = vtanh.f32 %v94_v45  ;;  %v98_v54 = vmul.f32 %v1492_v48, %v97_v38  ;;  %v140_v55 = vstv %s1458_s17  ;;  %v143_v56 = vstv %s1462_s18  ;;  %s1523_s1 = sld [smem:[#allocation2 + $0x20]]  ;;  %s1533_s29 = sld [smem:[#allocation2 + $0x2a]] }
  0x26   :  { %v1503_v57 = vpop.eup %1270  ;;  %v104_v58 = vmul.f32 %v1498_v53, %v103_v42  ;;  %v141_v59 = vmul.f32 %v1492_v48, %v140_v55  ;;  %v146_v60 = vstv %s1464_s19  ;;  %v149_v61 = vstv %s1469_s0  ;;  %s1535_s30 = sld [smem:[#allocation2 + $0x34]]  ;;  %s1543_s3 = sld [smem:[#allocation2 + $0x3e]] }
  0x27   :  { %v1511_v62 = vpop.eup %1272  ;;  %v101_v63 = vadd.f32 %v100_v41, %v98_v54  ;;  %v107_v0 = vmul.f32 %v1503_v57, %v106_v43  ;;  %v147_v1 = vmul.f32 %v1498_v53, %v146_v60  ;;  %v150_v2 = vmul.f32 %v1503_v57, %v149_v61  ;;  %s1545_s4 = sld [smem:[#allocation2 + $0x48]]  ;;  %s1551_s5 = sld [smem:[#allocation2 + $0x52]] }
  0x28   :  { %v1516_v3 = vpop.eup %1274  ;;  %v110_v4 = vmul.f32 %v1511_v62, %v109_v44  ;;  %v144_v5 = vadd.f32 %v143_v56, %v141_v59  ;;  %v152_v6 = vstv %s1471_s20  ;;  %v155_v7 = vstv %s1475_s21  ;;  %s1553_s6 = sld [smem:[#allocation2 + $0x5c]]  ;;  %s1562_s7 = sld [smem:[#allocation2 + $0x66]] }
  0x29   :  { %v1525_v8 = vpop.eup %1276  ;;  %v113_v9 = vmul.f32 %v1516_v3, %v112_v46  ;;  %v129_v10 = vadd.f32 %v104_v58, %v101_v63  ;;  %v153_v11 = vmul.f32 %v1511_v62, %v152_v6  ;;  %v156_v12 = vmul.f32 %v1516_v3, %v155_v7  ;;  %s1564_s8 = sld [smem:[#allocation2 + $0x70]]  ;;  %s1575_s9 = sld [smem:[#allocation2 + $0x17]] }
  0x2a   :  { %v116_v13 = vmul.f32 %v1525_v8, %v115_v47  ;;  %v130_v14 = vadd.f32 %v110_v4, %v107_v0  ;;  %v158_v15 = vstv %s1477_s22  ;;  %v161_v16 = vstv %s1482_s23  ;;  %s1578_s10 = sld [smem:[#allocation2 + $0x7b]]  ;;  %s1580_s11 = sld [smem:[#allocation2 + $0x21]] }
  0x2b   :  { %v1537_v17 = vpop.eup %1278  ;;  %v159_v18 = vmul.f32 %v1525_v8, %v158_v15  ;;  %v164_v19 = vstv %s1484_s24  ;;  %v167_v20 = vstv %s1488_s25  ;;  %v170_v21 = vstv %s1490_s26  ;;  %s1584_s12 = sld [smem:[#allocation2 + $0x2b]]  ;;  %s1586_s13 = sld [smem:[#allocation2 + $0x35]] }
  0x2c   :  { %v1547_v22 = vpop.eup %1280  ;;  %v119_v23 = vmul.f32 %v1537_v17, %v118_v49  ;;  %v131_v24 = vadd.f32 %v116_v13, %v113_v9  ;;  %v134_v25 = vadd.f32 %v130_v14, %v129_v10  ;;  %v162_v26 = vmul.f32 %v1537_v17, %v161_v16  ;;  %s1590_s14 = sld [smem:[#allocation2 + $0x3f]]  ;;  %s1592_s15 = sld [smem:[#allocation2 + $0x49]] }
  0x2d   :  { %v1555_v27 = vpop.eup %1282  ;;  %v122_v28 = vmul.f32 %v1547_v22, %v121_v50  ;;  %v165_v29 = vmul.f32 %v1547_v22, %v164_v19  ;;  %v172_v30 = vadd.f32 %v147_v1, %v144_v5  ;;  %v173_v31 = vadd.f32 %v153_v11, %v150_v2  ;;  %s1600_s16 = sld [smem:[#allocation2 + $0x53]]  ;;  %s1602_s17 = sld [smem:[#allocation2 + $0x5d]] }
  0x2e   :  { %v125_v32 = vmul.f32 %v1555_v27, %v124_v51  ;;  %v168_v33 = vmul.f32 %v1555_v27, %v167_v20  ;;  %v174_v34 = vadd.f32 %v159_v18, %v156_v12  ;;  %v183_v35 = vstv %s1509_s27  ;;  %s1608_s18 = sld [smem:[#allocation2 + $0x67]]  ;;  %s1612_s19 = sld [smem:[#allocation2 + $0x71]] }
  0x2f   :  { %v1566_v36 = vpop.eup %1284  ;;  %v132_v37 = vadd.f32 %v122_v28, %v119_v23  ;;  %v175_v38 = vadd.f32 %v165_v29, %v162_v26  ;;  %v177_v39 = vadd.f32 %v173_v31, %v172_v30  ;;  %v184_v40 = vmul.f32 %v1492_v48, %v183_v35  ;;  %s1614_s0 = sld [smem:[#allocation2 + $0x18]]  ;;  %s1619_s20 = sld [smem:[#allocation2 + $0x7c]] }
  0x30   :  { %v128_v41 = vmul.f32 %v1566_v36, %v127_v52  ;;  %v171_v42 = vmul.f32 %v1566_v36, %v170_v21  ;;  %v186_v43 = vstv %s1521_s28  ;;  %v189_v44 = vstv %s1523_s1  ;;  %s1621_s21 = sld [smem:[#allocation2 + $0x22]]  ;;  %s1625_s22 = sld [smem:[#allocation2 + $0x2c]] }
  0x31   :  { %v135_v45 = vadd.f32 %v132_v37, %v131_v24  ;;  %v178_v46 = vadd.f32 %v175_v38, %v174_v34  ;;  %v187_v47 = vadd.f32 %v186_v43, %v184_v40  ;;  %v190_v49 = vmul.f32 %v1498_v53, %v189_v44  ;;  %s1627_s23 = sld [smem:[#allocation2 + $0x36]]  ;;  %s1633_s24 = sld [smem:[#allocation2 + $0x40]] }
  0x32   :  { %v133_v50 = vadd.f32 %v128_v41, %v125_v32  ;;  %v176_v51 = vadd.f32 %v171_v42, %v168_v33  ;;  %v192_v52 = vstv %s1533_s29  ;;  %v195_v54 = vstv %s1535_s30  ;;  %s1635_s25 = sld [smem:[#allocation2 + $0x4a]]  ;;  %s1643_s26 = sld [smem:[#allocation2 + $0x54]] }
  0x33   :  { %v136_v55 = vadd.f32 %v135_v45, %v134_v25  ;;  %v179_v56 = vadd.f32 %v178_v46, %v177_v39  ;;  %v193_v58 = vmul.f32 %v1503_v57, %v192_v52  ;;  %v196_v59 = vmul.f32 %v1511_v62, %v195_v54  ;;  %s1645_s27 = sld [smem:[#allocation2 + $0x5e]]  ;;  %s1650_s28 = sld [smem:[#allocation2 + $0x68]] }
  0x34   :  { %v198_v60 = vstv %s1543_s3  ;;  %v201_v61 = vstv %s1545_s4  ;;  %v204_v63 = vstv %s1551_s5  ;;  %v207_v0 = vstv %s1553_s6  ;;  %s1654_s1 = sld [smem:[#allocation2 + $0x72]]  ;;  %s1657_s29 = sld [smem:[#allocation2 + $0x19]] }
  0x35   :  { %v137_v1 = vadd.f32 %v136_v55, %v133_v50  ;;  %v180_v2 = vadd.f32 %v179_v56, %v176_v51  ;;  %v199_v4 = vmul.f32 %v1516_v3, %v198_v60  ;;  %v202_v5 = vmul.f32 %v1525_v8, %v201_v61  ;;  %s1664_s30 = sld [smem:[#allocation2 + $0x7d]]  ;;  %s1666_s3 = sld [smem:[#allocation2 + $0x23]] }
  0x36   :  { %v205_v6 = vmul.f32 %v1537_v17, %v204_v63  ;;  %v208_v7 = vmul.f32 %v1547_v22, %v207_v0  ;;  %v210_v9 = vstv %s1562_s7  ;;  %v213_v10 = vstv %s1564_s8  ;;  %s1672_s4 = sld [smem:[#allocation2 + $0x2d]]  ;;  %s1674_s5 = sld [smem:[#allocation2 + $0x37]] }
  0x37   :  { %1286 = vtanh.f32 %v137_v1  ;;  %v211_v11 = vmul.f32 %v1555_v27, %v210_v9  ;;  %v214_v12 = vmul.f32 %v1566_v36, %v213_v10  ;;  %v215_v13 = vadd.f32 %v190_v49, %v187_v47  ;;  %s1680_s6 = sld [smem:[#allocation2 + $0x41]]  ;;  %s1682_s7 = sld [smem:[#allocation2 + $0x4b]] }
  0x38   :  { %1288 = vtanh.f32 %v180_v2  ;;  %v216_v14 = vadd.f32 %v196_v59, %v193_v58  ;;  %v217_v15 = vadd.f32 %v202_v5, %v199_v4  ;;  %v218_v16 = vadd.f32 %v208_v7, %v205_v6  ;;  %s1690_s8 = sld [smem:[#allocation2 + $0x55]] }
  0x39   :  { %v219_v18 = vadd.f32 %v214_v12, %v211_v11  ;;  %v226_v19 = vstv %s1575_s9  ;;  %v229_v20 = vstv %s1578_s10  ;;  %v232_v21 = vstv %s1580_s11  ;;  %s1692_s9 = sld [smem:[#allocation2 + $0x5f]]  ;;  %s1697_s10 = sld [smem:[#allocation2 + $0x69]] }
  0x3a   :  { %v220_v23 = vadd.f32 %v216_v14, %v215_v13  ;;  %v221_v24 = vadd.f32 %v218_v16, %v217_v15  ;;  %v227_v25 = vmul.f32 %v1492_v48, %v226_v19  ;;  %v233_v26 = vmul.f32 %v1498_v53, %v232_v21  ;;  %s1701_s11 = sld [smem:[#allocation2 + $0x73]] }
  0x3b   :  { %v235_v28 = vstv %s1584_s12  ;;  %v238_v29 = vstv %s1586_s13  ;;  %v241_v30 = vstv %s1590_s14  ;;  %v244_v31 = vstv %s1592_s15  ;;  %s1704_s12 = sld [smem:[#allocation2 + $0x1a]]  ;;  %s1709_s13 = sld [smem:[#allocation2 + $0x7e]] }
  0x3c   :  { %v222_v32 = vadd.f32 %v221_v24, %v220_v23  ;;  %v230_v33 = vadd.f32 %v229_v20, %v227_v25  ;;  %v236_v34 = vmul.f32 %v1503_v57, %v235_v28  ;;  %v239_v35 = vmul.f32 %v1511_v62, %v238_v29  ;;  %s1711_s14 = sld [smem:[#allocation2 + $0x24]]  ;;  %s1717_s15 = sld [smem:[#allocation2 + $0x2e]] }
  0x3d   :  { %v242_v37 = vmul.f32 %v1516_v3, %v241_v30  ;;  %v245_v38 = vmul.f32 %v1525_v8, %v244_v31  ;;  %v247_v39 = vstv %s1600_s16  ;;  %v250_v40 = vstv %s1602_s17  ;;  %s1719_s16 = sld [smem:[#allocation2 + $0x38]]  ;;  %s1725_s17 = sld [smem:[#allocation2 + $0x42]] }
  0x3e   :  { %v223_v41 = vadd.f32 %v222_v32, %v219_v18  ;;  %v248_v42 = vmul.f32 %v1537_v17, %v247_v39  ;;  %v251_v43 = vmul.f32 %v1547_v22, %v250_v40  ;;  %v253_v44 = vstv %s1608_s18  ;;  %s1727_s18 = sld [smem:[#allocation2 + $0x4c]] }
  0x3f   :  { %v254_v45 = vmul.f32 %v1555_v27, %v253_v44  ;;  %v256_v46 = vstv %s1612_s19  ;;  %v258_v47 = vadd.f32 %v233_v26, %v230_v33  ;;  %v259_v49 = vadd.f32 %v239_v35, %v236_v34  ;;  %s1735_s19 = sld [smem:[#allocation2 + $0x56]] }
  0x40   :  { %1290 = vtanh.f32 %v223_v41  ;;  %v257_v50 = vmul.f32 %v1566_v36, %v256_v46  ;;  %v260_v51 = vadd.f32 %v245_v38, %v242_v37  ;;  %v261_v52 = vadd.f32 %v251_v43, %v248_v42 }
  0x41   :  { %v1659_v54 = vpop.eup %1286  ;;  %v263_v55 = vadd.f32 %v259_v49, %v258_v47  ;;  %v269_v56 = vstv %s1614_s0  ;;  %v272_v58 = vstv %s1619_s20  ;;  %v275_v59 = vstv %s1621_s21  ;;  %s1737_s0 = sld [smem:[#allocation2 + $0x60]]  ;;  %s1742_s20 = sld [smem:[#allocation2 + $0x6a]] }
  0x42   :  { %v1668_v60 = vpop.eup %1288  ;;  %v262_v61 = vadd.f32 %v257_v50, %v254_v45  ;;  %v264_v63 = vadd.f32 %v261_v52, %v260_v51  ;;  %v270_v0 = vmul.f32 %v1492_v48, %v269_v56  ;;  %v276_v1 = vmul.f32 %v1498_v53, %v275_v59  ;;  %s1746_s21 = sld [smem:[#allocation2 + $0x74]] }
  0x43   :  { %v278_v2 = vstv %s1625_s22  ;;  %v281_v4 = vstv %s1627_s23  ;;  %v284_v5 = vstv %s1633_s24  ;;  %v287_v6 = vstv %s1635_s25  ;;  %s1749_s22 = sld [smem:[#allocation2 + $0x1b]]  ;;  %s1754_s23 = sld [smem:[#allocation2 + $0x7f]] }
  0x44   :  { %v265_v7 = vadd.f32 %v264_v63, %v263_v55  ;;  %v273_v9 = vadd.f32 %v272_v58, %v270_v0  ;;  %v279_v10 = vmul.f32 %v1503_v57, %v278_v2  ;;  %v282_v11 = vmul.f32 %v1511_v62, %v281_v4  ;;  %s1756_s24 = sld [smem:[#allocation2 + $0x25]]  ;;  %s1762_s25 = sld [smem:[#allocation2 + $0x2f]] }
  0x45   :  { %v285_v12 = vmul.f32 %v1516_v3, %v284_v5  ;;  %v288_v13 = vmul.f32 %v1525_v8, %v287_v6  ;;  %v290_v14 = vstv %s1643_s26  ;;  %v293_v15 = vstv %s1645_s27  ;;  %s1764_s26 = sld [smem:[#allocation2 + $0x39]]  ;;  %s1770_s27 = sld [smem:[#allocation2 + $0x43]] }
  0x46   :  { %v266_v16 = vadd.f32 %v265_v7, %v262_v61  ;;  %v291_v18 = vmul.f32 %v1537_v17, %v290_v14  ;;  %v294_v19 = vmul.f32 %v1547_v22, %v293_v15  ;;  %v296_v20 = vstv %s1650_s28  ;;  %s1772_s28 = sld [smem:[#allocation2 + $0x4d]] }
  0x47   :  { %v297_v21 = vmul.f32 %v1555_v27, %v296_v20  ;;  %v299_v23 = vstv %s1654_s1  ;;  %v301_v24 = vadd.f32 %v276_v1, %v273_v9  ;;  %v302_v25 = vadd.f32 %v282_v11, %v279_v10  ;;  %s1780_s1 = sld [smem:[#allocation2 + $0x57]] }
  0x48   :  { %1292 = vtanh.f32 %v266_v16  ;;  %v300_v26 = vmul.f32 %v1566_v36, %v299_v23  ;;  %v303_v28 = vadd.f32 %v288_v13, %v285_v12  ;;  %v304_v29 = vadd.f32 %v294_v19, %v291_v18 }
  0x49   :  { %v306_v30 = vadd.f32 %v302_v25, %v301_v24  ;;  %v312_v31 = vstv %s1657_s29  ;;  %v315_v32 = vstv %s1664_s30  ;;  %v318_v33 = vstv %s1666_s3  ;;  %s1782_s29 = sld [smem:[#allocation2 + $0x61]]  ;;  %s1787_s30 = sld [smem:[#allocation2 + $0x6b]] }
  0x4a   :  { %v1713_v34 = vpop.eup %1290  ;;  %v305_v35 = vadd.f32 %v300_v26, %v297_v21  ;;  %v307_v37 = vadd.f32 %v304_v29, %v303_v28  ;;  %v313_v38 = vmul.f32 %v1492_v48, %v312_v31  ;;  %v319_v39 = vmul.f32 %v1498_v53, %v318_v33  ;;  %s1791_s3 = sld [smem:[#allocation2 + $0x75]] }
  0x4b   :  { %v321_v40 = vstv %s1672_s4  ;;  %v324_v41 = vstv %s1674_s5  ;;  %v327_v42 = vstv %s1680_s6  ;;  %v330_v43 = vstv %s1682_s7  ;;  %s1794_s4 = sld [smem:[#allocation2 + $0x1c]]  ;;  %s1799_s5 = sld [smem:[#allocation2 + $0x80]] }
  0x4c   :  { %v308_v44 = vadd.f32 %v307_v37, %v306_v30  ;;  %v316_v45 = vadd.f32 %v315_v32, %v313_v38  ;;  %v322_v46 = vmul.f32 %v1503_v57, %v321_v40  ;;  %v325_v47 = vmul.f32 %v1511_v62, %v324_v41  ;;  %s1801_s6 = sld [smem:[#allocation2 + $0x26]]  ;;  %s1807_s7 = sld [smem:[#allocation2 + $0x30]] }
  0x4d   :  { %v328_v49 = vmul.f32 %v1516_v3, %v327_v42  ;;  %v331_v50 = vmul.f32 %v1525_v8, %v330_v43  ;;  %v333_v51 = vstv %s1690_s8  ;;  %v336_v52 = vstv %s1692_s9  ;;  %s1809_s8 = sld [smem:[#allocation2 + $0x3a]]  ;;  %s1815_s9 = sld [smem:[#allocation2 + $0x44]] }
  0x4e   :  { %v309_v55 = vadd.f32 %v308_v44, %v305_v35  ;;  %v334_v56 = vmul.f32 %v1537_v17, %v333_v51  ;;  %v337_v58 = vmul.f32 %v1547_v22, %v336_v52  ;;  %v339_v59 = vstv %s1697_s10  ;;  %s1817_s10 = sld [smem:[#allocation2 + $0x4e]] }
  0x4f   :  { %v340_v61 = vmul.f32 %v1555_v27, %v339_v59  ;;  %v342_v63 = vstv %s1701_s11  ;;  %v344_v0 = vadd.f32 %v319_v39, %v316_v45  ;;  %v345_v1 = vadd.f32 %v325_v47, %v322_v46  ;;  %s1825_s11 = sld [smem:[#allocation2 + $0x58]] }
  0x50   :  { %1294 = vtanh.f32 %v309_v55  ;;  %v343_v2 = vmul.f32 %v1566_v36, %v342_v63  ;;  %v346_v4 = vadd.f32 %v331_v50, %v328_v49  ;;  %v347_v5 = vadd.f32 %v337_v58, %v334_v56 }
  0x51   :  { %v349_v6 = vadd.f32 %v345_v1, %v344_v0  ;;  %v355_v7 = vstv %s1704_s12  ;;  %v358_v9 = vstv %s1709_s13  ;;  %v361_v10 = vstv %s1711_s14  ;;  %s1827_s12 = sld [smem:[#allocation2 + $0x62]]  ;;  %s1832_s13 = sld [smem:[#allocation2 + $0x6c]] }
  0x52   :  { %v1758_v11 = vpop.eup %1292  ;;  %v348_v12 = vadd.f32 %v343_v2, %v340_v61  ;;  %v350_v13 = vadd.f32 %v347_v5, %v346_v4  ;;  %v356_v14 = vmul.f32 %v1492_v48, %v355_v7  ;;  %v362_v15 = vmul.f32 %v1498_v53, %v361_v10  ;;  %s1836_s14 = sld [smem:[#allocation2 + $0x76]] }
  0x53   :  { %v364_v16 = vstv %s1717_s15  ;;  %v367_v18 = vstv %s1719_s16  ;;  %v370_v19 = vstv %s1725_s17  ;;  %v373_v20 = vstv %s1727_s18  ;;  %s1839_s15 = sld [smem:[#allocation2 + $0x1d]]  ;;  %s1844_s16 = sld [smem:[#allocation2 + $0x81]] }
  0x54   :  { %v351_v21 = vadd.f32 %v350_v13, %v349_v6  ;;  %v359_v23 = vadd.f32 %v358_v9, %v356_v14  ;;  %v365_v24 = vmul.f32 %v1503_v57, %v364_v16  ;;  %v368_v25 = vmul.f32 %v1511_v62, %v367_v18  ;;  %s1846_s17 = sld [smem:[#allocation2 + $0x27]]  ;;  %s1852_s18 = sld [smem:[#allocation2 + $0x31]] }
  0x55   :  { %v371_v26 = vmul.f32 %v1516_v3, %v370_v19  ;;  %v374_v28 = vmul.f32 %v1525_v8, %v373_v20  ;;  %v376_v29 = vstv %s1735_s19  ;;  %v379_v30 = vstv %s1737_s0  ;;  %s1854_s19 = sld [smem:[#allocation2 + $0x3b]]  ;;  %s1860_s0 = sld [smem:[#allocation2 + $0x45]] }
  0x56   :  { %v352_v31 = vadd.f32 %v351_v21, %v348_v12  ;;  %v377_v32 = vmul.f32 %v1537_v17, %v376_v29  ;;  %v380_v33 = vmul.f32 %v1547_v22, %v379_v30  ;;  %v382_v35 = vstv %s1742_s20  ;;  %s1862_s20 = sld [smem:[#allocation2 + $0x4f]] }
  0x57   :  { %v383_v37 = vmul.f32 %v1555_v27, %v382_v35  ;;  %v385_v38 = vstv %s1746_s21  ;;  %v387_v39 = vadd.f32 %v362_v15, %v359_v23  ;;  %v388_v40 = vadd.f32 %v368_v25, %v365_v24  ;;  %s1870_s21 = sld [smem:[#allocation2 + $0x59]] }
  0x58   :  { %1296 = vtanh.f32 %v352_v31  ;;  %v386_v41 = vmul.f32 %v1566_v36, %v385_v38  ;;  %v389_v42 = vadd.f32 %v374_v28, %v371_v26  ;;  %v390_v43 = vadd.f32 %v380_v33, %v377_v32 }
  0x59   :  { %v392_v44 = vadd.f32 %v388_v40, %v387_v39  ;;  %v398_v45 = vstv %s1749_s22  ;;  %v401_v46 = vstv %s1754_s23  ;;  %v404_v47 = vstv %s1756_s24  ;;  %s1872_s22 = sld [smem:[#allocation2 + $0x63]]  ;;  %s1877_s23 = sld [smem:[#allocation2 + $0x6d]] }
  0x5a   :  { %v1803_v49 = vpop.eup %1294  ;;  %v391_v50 = vadd.f32 %v386_v41, %v383_v37  ;;  %v393_v51 = vadd.f32 %v390_v43, %v389_v42  ;;  %v399_v52 = vmul.f32 %v1492_v48, %v398_v45  ;;  %v405_v55 = vmul.f32 %v1498_v53, %v404_v47  ;;  %s1881_s24 = sld [smem:[#allocation2 + $0x77]] }
  0x5b   :  { %v407_v56 = vstv %s1762_s25  ;;  %v410_v58 = vstv %s1764_s26  ;;  %v413_v59 = vstv %s1770_s27  ;;  %v416_v61 = vstv %s1772_s28  ;;  %s1884_s25 = sld [smem:[#allocation2 + $0x82]]  ;;  %s1889_s26 = sld [smem:[#allocation2 + $0xe6]] }
  0x5c   :  { %v394_v63 = vadd.f32 %v393_v51, %v392_v44  ;;  %v402_v0 = vadd.f32 %v401_v46, %v399_v52  ;;  %v408_v1 = vmul.f32 %v1503_v57, %v407_v56  ;;  %v411_v2 = vmul.f32 %v1511_v62, %v410_v58  ;;  %s1891_s27 = sld [smem:[#allocation2 + $0x8c]]  ;;  %s1897_s28 = sld [smem:[#allocation2 + $0x96]] }
  0x5d   :  { %v414_v4 = vmul.f32 %v1516_v3, %v413_v59  ;;  %v417_v5 = vmul.f32 %v1525_v8, %v416_v61  ;;  %v419_v6 = vstv %s1780_s1  ;;  %v422_v7 = vstv %s1782_s29  ;;  %s1899_s1 = sld [smem:[#allocation2 + $0xa0]]  ;;  %s1905_s29 = sld [smem:[#allocation2 + $0xaa]] }
  0x5e   :  { %v395_v9 = vadd.f32 %v394_v63, %v391_v50  ;;  %v420_v10 = vmul.f32 %v1537_v17, %v419_v6  ;;  %v423_v12 = vmul.f32 %v1547_v22, %v422_v7  ;;  %v425_v13 = vstv %s1787_s30  ;;  %s1907_s30 = sld [smem:[#allocation2 + $0xb4]] }
  0x5f   :  { %v426_v14 = vmul.f32 %v1555_v27, %v425_v13  ;;  %v428_v15 = vstv %s1791_s3  ;;  %v430_v16 = vadd.f32 %v405_v55, %v402_v0  ;;  %v431_v18 = vadd.f32 %v411_v2, %v408_v1  ;;  %s1915_s3 = sld [smem:[#allocation2 + $0xbe]] }
  0x60   :  { %1298 = vtanh.f32 %v395_v9  ;;  %v429_v19 = vmul.f32 %v1566_v36, %v428_v15  ;;  %v432_v20 = vadd.f32 %v417_v5, %v414_v4  ;;  %v433_v21 = vadd.f32 %v423_v12, %v420_v10 }
  0x61   :  { %v435_v23 = vadd.f32 %v431_v18, %v430_v16  ;;  %v441_v24 = vstv %s1794_s4  ;;  %v444_v25 = vstv %s1799_s5  ;;  %v447_v26 = vstv %s1801_s6  ;;  %s1917_s4 = sld [smem:[#allocation2 + $0xc8]]  ;;  %s1922_s5 = sld [smem:[#allocation2 + $0xd2]] }
  0x62   :  { %v1848_v28 = vpop.eup %1296  ;;  %v434_v29 = vadd.f32 %v429_v19, %v426_v14  ;;  %v436_v30 = vadd.f32 %v433_v21, %v432_v20  ;;  %v442_v31 = vmul.f32 %v1492_v48, %v441_v24  ;;  %v448_v32 = vmul.f32 %v1498_v53, %v447_v26  ;;  %s1926_s6 = sld [smem:[#allocation2 + $0xdc]] }
  0x63   :  { %v450_v33 = vstv %s1807_s7  ;;  %v453_v35 = vstv %s1809_s8  ;;  %v456_v37 = vstv %s1815_s9  ;;  %v459_v38 = vstv %s1817_s10  ;;  %s1929_s7 = sld [smem:[#allocation2 + $0x83]]  ;;  %s1931_s8 = sld [smem:[#allocation2 + $0xe7]] }
  0x64   :  { %v437_v39 = vadd.f32 %v436_v30, %v435_v23  ;;  %v445_v40 = vadd.f32 %v444_v25, %v442_v31  ;;  %v451_v41 = vmul.f32 %v1503_v57, %v450_v33  ;;  %v454_v42 = vmul.f32 %v1511_v62, %v453_v35  ;;  %s1936_s9 = sld [smem:[#allocation2 + $0x8d]]  ;;  %s1938_s10 = sld [smem:[#allocation2 + $0x97]] }
  0x65   :  { %v457_v43 = vmul.f32 %v1516_v3, %v456_v37  ;;  %v460_v44 = vmul.f32 %v1525_v8, %v459_v38  ;;  %v462_v45 = vstv %s1825_s11  ;;  %v465_v46 = vstv %s1827_s12  ;;  %s1944_s11 = sld [smem:[#allocation2 + $0xa1]]  ;;  %s1950_s12 = sld [smem:[#allocation2 + $0xab]] }
  0x66   :  { %v438_v47 = vadd.f32 %v437_v39, %v434_v29  ;;  %v463_v50 = vmul.f32 %v1537_v17, %v462_v45  ;;  %v466_v51 = vmul.f32 %v1547_v22, %v465_v46  ;;  %v468_v52 = vstv %s1832_s13  ;;  %s1954_s13 = sld [smem:[#allocation2 + $0xb5]] }
  0x67   :  { %v469_v55 = vmul.f32 %v1555_v27, %v468_v52  ;;  %v471_v56 = vstv %s1836_s14  ;;  %v473_v58 = vadd.f32 %v448_v32, %v445_v40  ;;  %v474_v59 = vadd.f32 %v454_v42, %v451_v41  ;;  %s1956_s14 = sld [smem:[#allocation2 + $0xbf]] }
  0x68   :  { %1300 = vtanh.f32 %v438_v47  ;;  %v472_v61 = vmul.f32 %v1566_v36, %v471_v56  ;;  %v475_v63 = vadd.f32 %v460_v44, %v457_v43  ;;  %v476_v0 = vadd.f32 %v466_v51, %v463_v50 }
  0x69   :  { %v478_v1 = vadd.f32 %v474_v59, %v473_v58  ;;  %v484_v2 = vstv %s1839_s15  ;;  %v487_v4 = vstv %s1844_s16  ;;  %v490_v5 = vstv %s1846_s17  ;;  %s1962_s15 = sld [smem:[#allocation2 + $0xc9]]  ;;  %s1964_s16 = sld [smem:[#allocation2 + $0xd3]] }
  0x6a   :  { %v1893_v6 = vpop.eup %1298  ;;  %v477_v7 = vadd.f32 %v472_v61, %v469_v55  ;;  %v479_v9 = vadd.f32 %v476_v0, %v475_v63  ;;  %v485_v10 = vmul.f32 %v1492_v48, %v484_v2  ;;  %v491_v12 = vmul.f32 %v1498_v53, %v490_v5  ;;  %s1969_s17 = sld [smem:[#allocation2 + $0xdd]] }
  0x6b   :  { %v493_v13 = vstv %s1852_s18  ;;  %v496_v14 = vstv %s1854_s19  ;;  %v499_v15 = vstv %s1860_s0  ;;  %v502_v16 = vstv %s1862_s20  ;;  %s1972_s18 = sld [smem:[#allocation2 + $0x84]]  ;;  %s1974_s19 = sld [smem:[#allocation2 + $0xe8]] }
  0x6c   :  { %v480_v18 = vadd.f32 %v479_v9, %v478_v1  ;;  %v488_v48 = vadd.f32 %v487_v4, %v485_v10  ;;  %v494_v19 = vmul.f32 %v1503_v57, %v493_v13  ;;  %v497_v53 = vmul.f32 %v1511_v62, %v496_v14  ;;  %s1978_s0 = sld [smem:[#allocation2 + $0x8e]]  ;;  %s1980_s20 = sld [smem:[#allocation2 + $0x98]] }
  0x6d   :  { %v500_v20 = vmul.f32 %v1516_v3, %v499_v15  ;;  %v503_v21 = vmul.f32 %v1525_v8, %v502_v16  ;;  %v505_v23 = vstv %s1870_s21  ;;  %v508_v24 = vstv %s1872_s22  ;;  %s1985_s21 = sld [smem:[#allocation2 + $0xa2]]  ;;  %s1992_s22 = sld [smem:[#allocation2 + $0xac]] }
  0x6e   :  { %v481_v25 = vadd.f32 %v480_v18, %v477_v7  ;;  %v506_v26 = vmul.f32 %v1537_v17, %v505_v23  ;;  %v509_v29 = vmul.f32 %v1547_v22, %v508_v24  ;;  %v511_v57 = vstv %s1877_s23  ;;  %s1997_s23 = sld [smem:[#allocation2 + $0xb6]] }
  0x6f   :  { %v512_v62 = vmul.f32 %v1555_v27, %v511_v57  ;;  %v514_v3 = vstv %s1881_s24  ;;  %v516_v8 = vadd.f32 %v491_v12, %v488_v48  ;;  %v517_v30 = vadd.f32 %v497_v53, %v494_v19  ;;  %s2002_s24 = sld [smem:[#allocation2 + $0xc0]] }
  0x70   :  { %1302 = vtanh.f32 %v481_v25  ;;  %v515_v31 = vmul.f32 %v1566_v36, %v514_v3  ;;  %v518_v32 = vadd.f32 %v503_v21, %v500_v20  ;;  %v519_v17 = vadd.f32 %v509_v29, %v506_v26 }
  0x71   :  { %v521_v22 = vadd.f32 %v517_v30, %v516_v8  ;;  %v527_v27 = vstv %s1884_s25  ;;  %v530_v33 = vstv %s1889_s26  ;;  %v533_v35 = vstv %s1891_s27  ;;  %s2004_s25 = sld [smem:[#allocation2 + $0xca]]  ;;  %s2013_s26 = sld [smem:[#allocation2 + $0xd4]] }
  0x72   :  { %v1940_v37 = vpop.eup %1300  ;;  %v520_v36 = vadd.f32 %v515_v31, %v512_v62  ;;  %v522_v38 = vadd.f32 %v519_v17, %v518_v32  ;;  %v528_v39 = vmul.f32 %v1659_v54, %v527_v27  ;;  %v534_v40 = vmul.f32 %v1668_v60, %v533_v35  ;;  %s2015_s27 = sld [smem:[#allocation2 + $0xde]] }
  0x73   :  { %v536_v41 = vstv %s1897_s28  ;;  %v539_v42 = vstv %s1899_s1  ;;  %v542_v43 = vstv %s1905_s29  ;;  %v545_v44 = vstv %s1907_s30  ;;  %s2022_s28 = sld [smem:[#allocation2 + $0x85]]  ;;  %s2027_s1 = sld [smem:[#allocation2 + $0xe9]] }
  0x74   :  { %v523_v45 = vadd.f32 %v522_v38, %v521_v22  ;;  %v531_v46 = vadd.f32 %v530_v33, %v528_v39  ;;  %v537_v47 = vmul.f32 %v1713_v34, %v536_v41  ;;  %v540_v50 = vmul.f32 %v1758_v11, %v539_v42  ;;  %s2033_s29 = sld [smem:[#allocation2 + $0x8f]]  ;;  %s2035_s30 = sld [smem:[#allocation2 + $0x99]] }
  0x75   :  { %v543_v51 = vmul.f32 %v1803_v49, %v542_v43  ;;  %v546_v52 = vmul.f32 %v1848_v28, %v545_v44  ;;  %v548_v55 = vstv %s1915_s3  ;;  %v551_v56 = vstv %s1917_s4  ;;  %s2043_s3 = sld [smem:[#allocation2 + $0xa3]]  ;;  %s2048_s4 = sld [smem:[#allocation2 + $0xad]] }
  0x76   :  { %v524_v58 = vadd.f32 %v523_v45, %v520_v36  ;;  %v549_v59 = vmul.f32 %v1893_v6, %v548_v55  ;;  %v552_v61 = vmul.f32 %v1940_v37, %v551_v56  ;;  %v554_v63 = vstv %s1922_s5  ;;  %s2050_s5 = sld [smem:[#allocation2 + $0xb7]] }
  0x77   :  { %v557_v0 = vstv %s1926_s6  ;;  %v559_v1 = vadd.f32 %v534_v40, %v531_v46  ;;  %v560_v2 = vadd.f32 %v540_v50, %v537_v47  ;;  %v561_v4 = vadd.f32 %v546_v52, %v543_v51  ;;  %s2054_s6 = sld [smem:[#allocation2 + $0xc1]] }
  0x78   :  { %1304 = vtanh.f32 %v524_v58  ;;  %v562_v5 = vadd.f32 %v552_v61, %v549_v59  ;;  %v570_v7 = vstv %s1929_s7  ;;  %v573_v9 = vstv %s1931_s8  ;;  %s2056_s7 = sld [smem:[#allocation2 + $0xcb]]  ;;  %s2060_s8 = sld [smem:[#allocation2 + $0xd5]] }
  0x79   :  { %v564_v10 = vadd.f32 %v560_v2, %v559_v1  ;;  %v571_v12 = vmul.f32 %v1659_v54, %v570_v7  ;;  %v576_v13 = vstv %s1936_s9  ;;  %v579_v14 = vstv %s1938_s10  ;;  %s2064_s9 = sld [smem:[#allocation2 + $0xdf]]  ;;  %s2067_s10 = sld [smem:[#allocation2 + $0x86]] }
  0x7a   :  { %v1987_v15 = vpop.eup %1302  ;;  %v565_v16 = vadd.f32 %v562_v5, %v561_v4  ;;  %v577_v18 = vmul.f32 %v1668_v60, %v576_v13  ;;  %v580_v48 = vmul.f32 %v1713_v34, %v579_v14  ;;  %v582_v19 = vstv %s1944_s11  ;;  %s2071_s11 = sld [smem:[#allocation2 + $0xea]] }
  0x7b   :  { %v555_v53 = vmul.f32 %v1987_v15, %v554_v63  ;;  %v574_v20 = vadd.f32 %v573_v9, %v571_v12  ;;  %v583_v21 = vmul.f32 %v1758_v11, %v582_v19  ;;  %v585_v23 = vstv %s1950_s12  ;;  %s2073_s12 = sld [smem:[#allocation2 + $0x90]] }
  0x7c   :  { %v566_v24 = vadd.f32 %v565_v16, %v564_v10  ;;  %v586_v25 = vmul.f32 %v1803_v49, %v585_v23  ;;  %v588_v26 = vstv %s1954_s13  ;;  %v591_v29 = vstv %s1956_s14  ;;  %s2077_s13 = sld [smem:[#allocation2 + $0x9a]]  ;;  %s2079_s14 = sld [smem:[#allocation2 + $0xa4]] }
  0x7d   :  { %v589_v57 = vmul.f32 %v1848_v28, %v588_v26  ;;  %v592_v62 = vmul.f32 %v1893_v6, %v591_v29  ;;  %v594_v3 = vstv %s1962_s15  ;;  %v597_v8 = vstv %s1964_s16  ;;  %s2084_s15 = sld [smem:[#allocation2 + $0xae]]  ;;  %s2086_s16 = sld [smem:[#allocation2 + $0xb8]] }
  0x7e   :  { %v595_v30 = vmul.f32 %v1940_v37, %v594_v3  ;;  %v598_v31 = vmul.f32 %v1987_v15, %v597_v8  ;;  %v600_v32 = vstv %s1969_s17  ;;  %v602_v17 = vadd.f32 %v577_v18, %v574_v20  ;;  %s2095_s17 = sld [smem:[#allocation2 + $0xc2]] }
  0x7f   :  { %v603_v22 = vadd.f32 %v583_v21, %v580_v48  ;;  %v604_v27 = vadd.f32 %v589_v57, %v586_v25  ;;  %v613_v33 = vstv %s1972_s18  ;;  %v616_v35 = vstv %s1974_s19  ;;  %s2097_s18 = sld [smem:[#allocation2 + $0xcc]]  ;;  %s2102_s19 = sld [smem:[#allocation2 + $0xd6]] }
  0x80   :  { %v605_v36 = vadd.f32 %v595_v30, %v592_v62  ;;  %v614_v38 = vmul.f32 %v1659_v54, %v613_v33  ;;  %v619_v39 = vstv %s1978_s0  ;;  %v622_v40 = vstv %s1980_s20  ;;  %s2106_s0 = sld [smem:[#allocation2 + $0xe0]]  ;;  %s2109_s20 = sld [smem:[#allocation2 + $0x87]] }
  0x81   :  { %v607_v41 = vadd.f32 %v603_v22, %v602_v17  ;;  %v620_v42 = vmul.f32 %v1668_v60, %v619_v39  ;;  %v623_v43 = vmul.f32 %v1713_v34, %v622_v40  ;;  %v625_v44 = vstv %s1985_s21  ;;  %s2114_s21 = sld [smem:[#allocation2 + $0xeb]] }
  0x82   :  { %v2029_v45 = vpop.eup %1304  ;;  %v608_v46 = vadd.f32 %v605_v36, %v604_v27  ;;  %v617_v47 = vadd.f32 %v616_v35, %v614_v38  ;;  %v626_v50 = vmul.f32 %v1758_v11, %v625_v44  ;;  %v628_v51 = vstv %s1992_s22  ;;  %s2116_s22 = sld [smem:[#allocation2 + $0x91]] }
  0x83   :  { %v558_v52 = vmul.f32 %v2029_v45, %v557_v0  ;;  %v601_v55 = vmul.f32 %v2029_v45, %v600_v32  ;;  %v629_v56 = vmul.f32 %v1803_v49, %v628_v51  ;;  %v631_v58 = vstv %s1997_s23  ;;  %s2120_s23 = sld [smem:[#allocation2 + $0x9b]] }
  0x84   :  { %v609_v59 = vadd.f32 %v608_v46, %v607_v41  ;;  %v632_v61 = vmul.f32 %v1848_v28, %v631_v58  ;;  %v634_v63 = vstv %s2002_s24  ;;  %v637_v1 = vstv %s2004_s25  ;;  %s2122_s24 = sld [smem:[#allocation2 + $0xa5]]  ;;  %s2130_s25 = sld [smem:[#allocation2 + $0xaf]] }
  0x85   :  { %v563_v2 = vadd.f32 %v558_v52, %v555_v53  ;;  %v606_v0 = vadd.f32 %v601_v55, %v598_v31  ;;  %v635_v4 = vmul.f32 %v1893_v6, %v634_v63  ;;  %v638_v5 = vmul.f32 %v1940_v37, %v637_v1 }
  0x86   :  { %v640_v7 = vstv %s2013_s26  ;;  %v643_v9 = vstv %s2015_s27  ;;  %v645_v10 = vadd.f32 %v620_v42, %v617_v47  ;;  %v646_v12 = vadd.f32 %v626_v50, %v623_v43  ;;  %s2132_s26 = sld [smem:[#allocation2 + $0xb9]]  ;;  %s2142_s27 = sld [smem:[#allocation2 + $0xc3]] }
  0x87   :  { %v567_v13 = vadd.f32 %v566_v24, %v563_v2  ;;  %v610_v14 = vadd.f32 %v609_v59, %v606_v0  ;;  %v641_v16 = vmul.f32 %v1987_v15, %v640_v7  ;;  %v644_v18 = vmul.f32 %v2029_v45, %v643_v9 }
  0x88   :  { %v647_v48 = vadd.f32 %v632_v61, %v629_v56  ;;  %v648_v19 = vadd.f32 %v638_v5, %v635_v4  ;;  %v650_v53 = vadd.f32 %v646_v12, %v645_v10  ;;  %v656_v20 = vstv %s2022_s28  ;;  %s2144_s28 = sld [smem:[#allocation2 + $0xcd]] }
  0x89   :  { %1306 = vtanh.f32 %v567_v13  ;;  %v649_v21 = vadd.f32 %v644_v18, %v641_v16  ;;  %v657_v23 = vmul.f32 %v1659_v54, %v656_v20  ;;  %v659_v24 = vstv %s2027_s1  ;;  %s2149_s1 = sld [smem:[#allocation2 + $0xd7]] }
  0x8a   :  { %1308 = vtanh.f32 %v610_v14  ;;  %v651_v25 = vadd.f32 %v648_v19, %v647_v48  ;;  %v662_v26 = vstv %s2033_s29  ;;  %v665_v29 = vstv %s2035_s30  ;;  %s2153_s29 = sld [smem:[#allocation2 + $0xe1]]  ;;  %s2156_s30 = sld [smem:[#allocation2 + $0x88]] }
  0x8b   :  { %v660_v57 = vadd.f32 %v659_v24, %v657_v23  ;;  %v663_v62 = vmul.f32 %v1668_v60, %v662_v26  ;;  %v666_v3 = vmul.f32 %v1713_v34, %v665_v29  ;;  %v668_v8 = vstv %s2043_s3  ;;  %s2161_s3 = sld [smem:[#allocation2 + $0xec]] }
  0x8c   :  { %v652_v30 = vadd.f32 %v651_v25, %v650_v53  ;;  %v669_v31 = vmul.f32 %v1758_v11, %v668_v8  ;;  %v671_v32 = vstv %s2048_s4  ;;  %v674_v17 = vstv %s2050_s5  ;;  %s2163_s4 = sld [smem:[#allocation2 + $0x92]]  ;;  %s2169_s5 = sld [smem:[#allocation2 + $0x9c]] }
  0x8d   :  { %v672_v22 = vmul.f32 %v1803_v49, %v671_v32  ;;  %v675_v27 = vmul.f32 %v1848_v28, %v674_v17  ;;  %v677_v33 = vstv %s2054_s6  ;;  %v680_v35 = vstv %s2056_s7  ;;  %s2171_s6 = sld [smem:[#allocation2 + $0xa6]]  ;;  %s2177_s7 = sld [smem:[#allocation2 + $0xb0]] }
  0x8e   :  { %v653_v36 = vadd.f32 %v652_v30, %v649_v21  ;;  %v678_v38 = vmul.f32 %v1893_v6, %v677_v33  ;;  %v681_v39 = vmul.f32 %v1940_v37, %v680_v35  ;;  %v683_v40 = vstv %s2060_s8  ;;  %s2179_s8 = sld [smem:[#allocation2 + $0xba]] }
  0x8f   :  { %v684_v41 = vmul.f32 %v1987_v15, %v683_v40  ;;  %v686_v42 = vstv %s2064_s9  ;;  %v688_v43 = vadd.f32 %v663_v62, %v660_v57  ;;  %v689_v44 = vadd.f32 %v669_v31, %v666_v3  ;;  %s2187_s9 = sld [smem:[#allocation2 + $0xc4]] }
  0x90   :  { %1310 = vtanh.f32 %v653_v36  ;;  %v687_v46 = vmul.f32 %v2029_v45, %v686_v42  ;;  %v690_v47 = vadd.f32 %v675_v27, %v672_v22  ;;  %v691_v50 = vadd.f32 %v681_v39, %v678_v38 }
  0x91   :  { %v693_v51 = vadd.f32 %v689_v44, %v688_v43  ;;  %v699_v52 = vstv %s2067_s10  ;;  %v702_v55 = vstv %s2071_s11  ;;  %v705_v56 = vstv %s2073_s12  ;;  %s2189_s10 = sld [smem:[#allocation2 + $0xce]]  ;;  %s2194_s11 = sld [smem:[#allocation2 + $0xd8]] }
  0x92   :  { %v692_v58 = vadd.f32 %v687_v46, %v684_v41  ;;  %v694_v59 = vadd.f32 %v691_v50, %v690_v47  ;;  %v700_v61 = vmul.f32 %v1659_v54, %v699_v52  ;;  %v706_v63 = vmul.f32 %v1668_v60, %v705_v56  ;;  %s2198_s12 = sld [smem:[#allocation2 + $0xe2]] }
  0x93   :  { %v2124_v1 = vpop.eup %1306  ;;  %v708_v2 = vstv %s2077_s13  ;;  %v711_v0 = vstv %s2079_s14  ;;  %v714_v4 = vstv %s2084_s15  ;;  %v717_v5 = vstv %s2086_s16  ;;  %s2201_s13 = sld [smem:[#allocation2 + $0x89]]  ;;  %s2206_s14 = sld [smem:[#allocation2 + $0xed]] }
  0x94   :  { %v2134_v7 = vpop.eup %1308  ;;  %v695_v9 = vadd.f32 %v694_v59, %v693_v51  ;;  %v703_v10 = vadd.f32 %v702_v55, %v700_v61  ;;  %v709_v12 = vmul.f32 %v1713_v34, %v708_v2  ;;  %v712_v13 = vmul.f32 %v1758_v11, %v711_v0  ;;  %s2208_s15 = sld [smem:[#allocation2 + $0x93]]  ;;  %s2214_s16 = sld [smem:[#allocation2 + $0x9d]] }
  0x95   :  { %v715_v14 = vmul.f32 %v1803_v49, %v714_v4  ;;  %v718_v16 = vmul.f32 %v1848_v28, %v717_v5  ;;  %v720_v18 = vstv %s2095_s17  ;;  %v723_v48 = vstv %s2097_s18  ;;  %s2216_s17 = sld [smem:[#allocation2 + $0xa7]]  ;;  %s2222_s18 = sld [smem:[#allocation2 + $0xb1]] }
  0x96   :  { %v696_v19 = vadd.f32 %v695_v9, %v692_v58  ;;  %v721_v53 = vmul.f32 %v1893_v6, %v720_v18  ;;  %v724_v20 = vmul.f32 %v1940_v37, %v723_v48  ;;  %v726_v21 = vstv %s2102_s19  ;;  %s2224_s19 = sld [smem:[#allocation2 + $0xbb]] }
  0x97   :  { %v727_v23 = vmul.f32 %v1987_v15, %v726_v21  ;;  %v729_v24 = vstv %s2106_s0  ;;  %v731_v25 = vadd.f32 %v706_v63, %v703_v10  ;;  %v732_v26 = vadd.f32 %v712_v13, %v709_v12  ;;  %s2232_s0 = sld [smem:[#allocation2 + $0xc5]] }
  0x98   :  { %1312 = vtanh.f32 %v696_v19  ;;  %v730_v29 = vmul.f32 %v2029_v45, %v729_v24  ;;  %v733_v57 = vadd.f32 %v718_v16, %v715_v14  ;;  %v734_v62 = vadd.f32 %v724_v20, %v721_v53 }
  0x99   :  { %v736_v3 = vadd.f32 %v732_v26, %v731_v25  ;;  %v742_v8 = vstv %s2109_s20  ;;  %v745_v30 = vstv %s2114_s21  ;;  %v748_v31 = vstv %s2116_s22  ;;  %s2234_s20 = sld [smem:[#allocation2 + $0xcf]]  ;;  %s2239_s21 = sld [smem:[#allocation2 + $0xd9]] }
  0x9a   :  { %v2165_v32 = vpop.eup %1310  ;;  %v735_v17 = vadd.f32 %v730_v29, %v727_v23  ;;  %v737_v22 = vadd.f32 %v734_v62, %v733_v57  ;;  %v743_v27 = vmul.f32 %v1659_v54, %v742_v8  ;;  %v749_v33 = vmul.f32 %v1668_v60, %v748_v31  ;;  %s2243_s22 = sld [smem:[#allocation2 + $0xe3]] }
  0x9b   :  { %v751_v35 = vstv %s2120_s23  ;;  %v754_v36 = vstv %s2122_s24  ;;  %v757_v38 = vstv %s2130_s25  ;;  %v760_v39 = vstv %s2132_s26  ;;  %s2246_s23 = sld [smem:[#allocation2 + $0x8a]]  ;;  %s2251_s24 = sld [smem:[#allocation2 + $0xee]] }
  0x9c   :  { %v738_v40 = vadd.f32 %v737_v22, %v736_v3  ;;  %v746_v41 = vadd.f32 %v745_v30, %v743_v27  ;;  %v752_v42 = vmul.f32 %v1713_v34, %v751_v35  ;;  %v755_v43 = vmul.f32 %v1758_v11, %v754_v36  ;;  %s2253_s25 = sld [smem:[#allocation2 + $0x94]]  ;;  %s2259_s26 = sld [smem:[#allocation2 + $0x9e]] }
  0x9d   :  { %v758_v44 = vmul.f32 %v1803_v49, %v757_v38  ;;  %v761_v46 = vmul.f32 %v1848_v28, %v760_v39  ;;  %v763_v47 = vstv %s2142_s27  ;;  %v766_v50 = vstv %s2144_s28  ;;  %s2261_s27 = sld [smem:[#allocation2 + $0xa8]]  ;;  %s2267_s28 = sld [smem:[#allocation2 + $0xb2]] }
  0x9e   :  { %v739_v51 = vadd.f32 %v738_v40, %v735_v17  ;;  %v764_v52 = vmul.f32 %v1893_v6, %v763_v47  ;;  %v767_v55 = vmul.f32 %v1940_v37, %v766_v50  ;;  %v769_v56 = vstv %s2149_s1  ;;  %s2269_s1 = sld [smem:[#allocation2 + $0xbc]] }
  0x9f   :  { %v770_v58 = vmul.f32 %v1987_v15, %v769_v56  ;;  %v772_v59 = vstv %s2153_s29  ;;  %v774_v61 = vadd.f32 %v749_v33, %v746_v41  ;;  %v775_v63 = vadd.f32 %v755_v43, %v752_v42  ;;  %s2277_s29 = sld [smem:[#allocation2 + $0xc6]] }
  0xa0   :  { %1314 = vtanh.f32 %v739_v51  ;;  %v773_v2 = vmul.f32 %v2029_v45, %v772_v59  ;;  %v776_v0 = vadd.f32 %v761_v46, %v758_v44  ;;  %v777_v4 = vadd.f32 %v767_v55, %v764_v52 }
  0xa1   :  { %v779_v5 = vadd.f32 %v775_v63, %v774_v61  ;;  %v785_v9 = vstv %s2156_s30  ;;  %v788_v10 = vstv %s2161_s3  ;;  %v791_v12 = vstv %s2163_s4  ;;  %s2279_s30 = sld [smem:[#allocation2 + $0xd0]]  ;;  %s2284_s3 = sld [smem:[#allocation2 + $0xda]] }
  0xa2   :  { %v2210_v13 = vpop.eup %1312  ;;  %v778_v14 = vadd.f32 %v773_v2, %v770_v58  ;;  %v780_v16 = vadd.f32 %v777_v4, %v776_v0  ;;  %v786_v18 = vmul.f32 %v1659_v54, %v785_v9  ;;  %v792_v48 = vmul.f32 %v1668_v60, %v791_v12  ;;  %s2288_s4 = sld [smem:[#allocation2 + $0xe4]] }
  0xa3   :  { %v794_v19 = vstv %s2169_s5  ;;  %v797_v53 = vstv %s2171_s6  ;;  %v800_v20 = vstv %s2177_s7  ;;  %v803_v21 = vstv %s2179_s8  ;;  %s2291_s5 = sld [smem:[#allocation2 + $0x8b]]  ;;  %s2296_s6 = sld [smem:[#allocation2 + $0xef]] }
  0xa4   :  { %v781_v23 = vadd.f32 %v780_v16, %v779_v5  ;;  %v789_v24 = vadd.f32 %v788_v10, %v786_v18  ;;  %v795_v25 = vmul.f32 %v1713_v34, %v794_v19  ;;  %v798_v26 = vmul.f32 %v1758_v11, %v797_v53  ;;  %s2298_s7 = sld [smem:[#allocation2 + $0x95]]  ;;  %s2304_s8 = sld [smem:[#allocation2 + $0x9f]] }
  0xa5   :  { %v801_v29 = vmul.f32 %v1803_v49, %v800_v20  ;;  %v804_v57 = vmul.f32 %v1848_v28, %v803_v21  ;;  %v806_v62 = vstv %s2187_s9  ;;  %v809_v3 = vstv %s2189_s10  ;;  %s2306_s9 = sld [smem:[#allocation2 + $0xa9]]  ;;  %s2312_s10 = sld [smem:[#allocation2 + $0xb3]] }
  0xa6   :  { %v782_v8 = vadd.f32 %v781_v23, %v778_v14  ;;  %v807_v30 = vmul.f32 %v1893_v6, %v806_v62  ;;  %v810_v31 = vmul.f32 %v1940_v37, %v809_v3  ;;  %v812_v17 = vstv %s2194_s11  ;;  %s2314_s11 = sld [smem:[#allocation2 + $0xbd]] }
  0xa7   :  { %v813_v22 = vmul.f32 %v1987_v15, %v812_v17  ;;  %v815_v27 = vstv %s2198_s12  ;;  %v817_v33 = vadd.f32 %v792_v48, %v789_v24  ;;  %v818_v35 = vadd.f32 %v798_v26, %v795_v25  ;;  %s2322_s12 = sld [smem:[#allocation2 + $0xc7]] }
  0xa8   :  { %1316 = vtanh.f32 %v782_v8  ;;  %v816_v36 = vmul.f32 %v2029_v45, %v815_v27  ;;  %v819_v38 = vadd.f32 %v804_v57, %v801_v29  ;;  %v820_v39 = vadd.f32 %v810_v31, %v807_v30 }
  0xa9   :  { %v822_v40 = vadd.f32 %v818_v35, %v817_v33  ;;  %v828_v41 = vstv %s2201_s13  ;;  %v831_v42 = vstv %s2206_s14  ;;  %v834_v43 = vstv %s2208_s15  ;;  %s2324_s13 = sld [smem:[#allocation2 + $0xd1]]  ;;  %s2329_s14 = sld [smem:[#allocation2 + $0xdb]] }
  0xaa   :  { %v2255_v44 = vpop.eup %1314  ;;  %v821_v46 = vadd.f32 %v816_v36, %v813_v22  ;;  %v823_v47 = vadd.f32 %v820_v39, %v819_v38  ;;  %v829_v50 = vmul.f32 %v1659_v54, %v828_v41  ;;  %v835_v51 = vmul.f32 %v1668_v60, %v834_v43  ;;  %s2333_s15 = sld [smem:[#allocation2 + $0xe5]] }
  0xab   :  { %v837_v52 = vstv %s2214_s16  ;;  %v840_v55 = vstv %s2216_s17  ;;  %v843_v56 = vstv %s2222_s18  ;;  %v846_v58 = vstv %s2224_s19  ;;  %s2339_s16 = sld [smem:[#allocation2 + $0xf0]]  ;;  %s2343_s17 = sld [smem:[#allocation2 + $0xfa]] }
  0xac   :  { %v824_v59 = vadd.f32 %v823_v47, %v822_v40  ;;  %v832_v61 = vadd.f32 %v831_v42, %v829_v50  ;;  %v838_v63 = vmul.f32 %v1713_v34, %v837_v52  ;;  %v841_v2 = vmul.f32 %v1758_v11, %v840_v55  ;;  %s2345_s18 = sld [smem:[#allocation2 + $0xf1]]  ;;  %s2351_s19 = sld [smem:[#allocation2 + $0xf2]] }
  0xad   :  { %v844_v0 = vmul.f32 %v1803_v49, %v843_v56  ;;  %v847_v4 = vmul.f32 %v1848_v28, %v846_v58  ;;  %v849_v5 = vstv %s2232_s0  ;;  %v852_v9 = vstv %s2234_s20  ;;  %s2353_s0 = sld [smem:[#allocation2 + $0xf3]]  ;;  %s2357_s20 = sld [smem:[#allocation2 + $0xf4]] }
  0xae   :  { %v825_v10 = vadd.f32 %v824_v59, %v821_v46  ;;  %v850_v12 = vmul.f32 %v1893_v6, %v849_v5  ;;  %v853_v14 = vmul.f32 %v1940_v37, %v852_v9  ;;  %v855_v16 = vstv %s2239_s21  ;;  %s2359_s21 = sld [smem:[#allocation2 + $0xf5]] }
  0xaf   :  { %v856_v18 = vmul.f32 %v1987_v15, %v855_v16  ;;  %v858_v48 = vstv %s2243_s22  ;;  %v860_v19 = vadd.f32 %v835_v51, %v832_v61  ;;  %v861_v53 = vadd.f32 %v841_v2, %v838_v63  ;;  %s2365_s22 = sld [smem:[#allocation2 + $0xf6]] }
  0xb0   :  { %1318 = vtanh.f32 %v825_v10  ;;  %v859_v20 = vmul.f32 %v2029_v45, %v858_v48  ;;  %v862_v21 = vadd.f32 %v847_v4, %v844_v0  ;;  %v863_v23 = vadd.f32 %v853_v14, %v850_v12 }
  0xb1   :  { %v865_v24 = vadd.f32 %v861_v53, %v860_v19  ;;  %v871_v25 = vstv %s2246_s23  ;;  %v874_v26 = vstv %s2251_s24  ;;  %v877_v29 = vstv %s2253_s25  ;;  %s2367_s23 = sld [smem:[#allocation2 + $0xf7]]  ;;  %s1262_s24 = sld [smem:[#allocation2 + $0xf8]] }
  0xb2   :  { %v2300_v57 = vpop.eup %1316  ;;  %v864_v62 = vadd.f32 %v859_v20, %v856_v18  ;;  %v866_v3 = vadd.f32 %v863_v23, %v862_v21  ;;  %v872_v8 = vmul.f32 %v1659_v54, %v871_v25  ;;  %v878_v30 = vmul.f32 %v1668_v60, %v877_v29  ;;  %s1263_s25 = sld [smem:[#allocation2 + $0xf9]] }
  0xb3   :  { %v880_v31 = vstv %s2259_s26  ;;  %v883_v17 = vstv %s2261_s27  ;;  %v886_v22 = vstv %s2267_s28  ;;  %v889_v27 = vstv %s2269_s1  ;;  %s1365_s26 = smov [#allocation5]  }
  0xb4   :  { %v867_v33 = vadd.f32 %v866_v3, %v865_v24  ;;  %v875_v35 = vadd.f32 %v874_v26, %v872_v8  ;;  %v881_v36 = vmul.f32 %v1713_v34, %v880_v31  ;;  %v884_v38 = vmul.f32 %v1758_v11, %v883_v17  ;;  %s1005_s27 = sshll.u32 %s1365_s26, 4  ;;  %s1006_s27 = int_to_ptr.vmem [resolvable:$true] %s1005_s27 }
  0xb5   :  { %v887_v39 = vmul.f32 %v1803_v49, %v886_v22  ;;  %v890_v40 = vmul.f32 %v1848_v28, %v889_v27  ;;  %v892_v41 = vstv %s2277_s29  ;;  %v895_v42 = vstv %s2279_s30  ;;  %s1338_s28 = scalar_lea.vmem %s1006_s27, 128  ;;  %p1343_p6 = scmp.lt.s32.totalorder %s1006_s27, %s1006_s27 }
  0xb6   :  { %v868_v43 = vadd.f32 %v867_v33, %v864_v62  ;;  %v893_v46 = vmul.f32 %v1893_v6, %v892_v41  ;;  %v896_v47 = vmul.f32 %v1940_v37, %v895_v42  ;;  %v898_v50 = vstv %s2284_s3  ;;  %p1339_p5 = scmp.ne.s32.totalorder %s1006_s27, %s1338_s28  ;;  %p1344_p7 = scmp.lt.s32.totalorder %s1338_s28, %s1338_s28 }
  0xb7   :  { %v899_v51 = vmul.f32 %v1987_v15, %v898_v50  ;;  %v901_v52 = vstv %s2288_s4  ;;  %v903_v55 = vadd.f32 %v878_v30, %v875_v35  ;;  %v904_v56 = vadd.f32 %v884_v38, %v881_v36 }
  0xb8   :  { %1320 = vtanh.f32 %v868_v43  ;;  %v902_v58 = vmul.f32 %v2029_v45, %v901_v52  ;;  %v905_v59 = vadd.f32 %v890_v40, %v887_v39  ;;  %v906_v61 = vadd.f32 %v896_v47, %v893_v46  ;;  %p1345_p8 = por %p1344_p7, %p1343_p6 }
  0xb9   :  { %v908_v63 = vadd.f32 %v904_v56, %v903_v55  ;;  %v914_v2 = vstv %s2291_s5  ;;  %v917_v0 = vstv %s2296_s6  ;;  %v920_v4 = vstv %s2298_s7 }
  0xba   :  { %v1319_v5 = vpop.eup %1318  ;;  %v907_v9 = vadd.f32 %v902_v58, %v899_v51  ;;  %v909_v10 = vadd.f32 %v906_v61, %v905_v59  ;;  %v915_v12 = vmul.f32 %v1659_v54, %v914_v2  ;;  %v921_v14 = vmul.f32 %v1668_v60, %v920_v4  ;;  %p1346_p9 = pnand %p1345_p8, %p1339_p5 }
  0xbb   :  { %v923_v16 = vstv %s2304_s8  ;;  %v926_v18 = vstv %s2306_s9  ;;  %v929_v48 = vstv %s2312_s10  ;;  %v932_v19 = vstv %s2314_s11 }
  0xbc   :  { %v910_v53 = vadd.f32 %v909_v10, %v908_v63  ;;  %v918_v54 = vadd.f32 %v917_v0, %v915_v12  ;;  %v924_v60 = vmul.f32 %v1713_v34, %v923_v16  ;;  %v927_v20 = vmul.f32 %v1758_v11, %v926_v18 }
  0xbd   :  { %v930_v21 = vmul.f32 %v1803_v49, %v929_v48  ;;  %v933_v23 = vmul.f32 %v1848_v28, %v932_v19  ;;  %v935_v24 = vstv %s2322_s12  ;;  %v938_v25 = vstv %s2324_s13 }
  0xbe   :  { %v936_v26 = vmul.f32 %v1893_v6, %v935_v24  ;;  %v939_v34 = vmul.f32 %v1940_v37, %v938_v25  ;;  %v941_v11 = vstv %s2329_s14  ;;  %v944_v49 = vstv %s2333_s15 }
  0xbf   :  { %v942_v29 = vmul.f32 %v1987_v15, %v941_v11  ;;  %v946_v28 = vadd.f32 %v921_v14, %v918_v54  ;;  %v947_v62 = vadd.f32 %v927_v20, %v924_v60  ;;  %v911_v3 = vadd.f32 %v910_v53, %v907_v9 }
  0xc0   :  { %v945_v8 = vmul.f32 %v2029_v45, %v944_v49  ;;  %v948_v30 = vadd.f32 %v933_v23, %v930_v21  ;;  %v949_v31 = vadd.f32 %v939_v34, %v936_v26  ;;  %v957_v37 = vstv %s2339_s16 }
  0xc1   :  { %v951_v6 = vadd.f32 %v947_v62, %v946_v28  ;;  %v958_v15 = vmul.f32 %v2124_v1, %v957_v37  ;;  %v963_v33 = vstv %s2345_s18  ;;  %v960_v35 = vstv %s2343_s17 }
  0xc2   :  { %v1321_v17 = vpop.eup %1320  ;;  %v950_v22 = vadd.f32 %v945_v8, %v942_v29  ;;  %v952_v27 = vadd.f32 %v949_v31, %v948_v30  ;;  %v966_v36 = vstv %s2351_s19  ;;  %v969_v38 = vstv %s2353_s0 }
  0xc3   :  { %1322 = vtanh.f32 %v911_v3  ;;  %v972_v40 = vstv %s2357_s20  ;;  %v975_v45 = vstv %s2359_s21  ;;  %v964_v41 = vmul.f32 %v2134_v7, %v963_v33 }
  0xc4   :  { %v953_v39 = vadd.f32 %v952_v27, %v951_v6  ;;  %v978_v42 = vstv %s2365_s22  ;;  %v981_v43 = vstv %s2367_s23  ;;  %v961_v47 = vadd.f32 %v960_v35, %v958_v15 }
  0xc5   :  { %v967_v50 = vmul.f32 %v2165_v32, %v966_v36  ;;  %v970_v51 = vmul.f32 %v2210_v13, %v969_v38  ;;  %v973_v1 = vmul.f32 %v2255_v44, %v972_v40  ;;  %v976_v52 = vmul.f32 %v2300_v57, %v975_v45 }
  0xc6   :  { %v954_v46 = vadd.f32 %v953_v39, %v950_v22  ;;  %v979_v55 = vmul.f32 %v1319_v5, %v978_v42  ;;  %v982_v56 = vmul.f32 %v1321_v17, %v981_v43  ;;  %v989_v58 = vadd.f32 %v964_v41, %v961_v47 }
  0xc7   :  { %v990_v59 = vadd.f32 %v970_v51, %v967_v50  ;;  %v991_v7 = vadd.f32 %v976_v52, %v973_v1  ;;  %v984_v2 = vstv %s1262_s24  ;;  %v987_v32 = vstv %s1263_s25 }
  0xc8   :  { %1324 = vtanh.f32 %v954_v46  ;;  %v992_v61 = vadd.f32 %v982_v56, %v979_v55 }
  0xc9   :  { %v994_v0 = vadd.f32 %v990_v59, %v989_v58 }
  0xca   :  { %v995_v4 = vadd.f32 %v992_v61, %v991_v7 }
  0xcc   :  { %v996_v12 = vadd.f32 %v995_v4, %v994_v0 }
  0xcd   :  { %v1323_v63 = vpop.eup %1322 }
  0xce   :  { %v985_v9 = vmul.f32 %v1323_v63, %v984_v2 }
  0xd2   :  { %v1325_v13 = vpop.eup %1324 }
  0xd3   :  { %v988_v10 = vmul.f32 %v1325_v13, %v987_v32 }
  0xd5   :  { %v993_v44 = vadd.f32 %v988_v10, %v985_v9 }
  0xd7   :  { %v997_v57 = vadd.f32 %v996_v12, %v993_v44 }
  0xd9   :  { %998 = vst [vmem:[#allocation5] sm:$0xff] %v997_v57 }
  0xda   :  { %1349 = shalt.err (!%p1346_p9)
}
  0xdb   :  { %s1350_s30 = scalar_lea.hbm %s2404_s2, 128 }
  0xdc   :  { %p1351_p10 = scmp.ne.s32.totalorder %s2404_s2, %s1350_s30  ;;  %p1354_p11 = scmp.lt.u32.totalorder %s1350_s30, %s2404_s2 }
  0xde   :  { %p1356_p12 = pnand %p1354_p11, %p1351_p10 }
  0xe0   :  { %1359 = shalt.err (!%p1356_p12)
}
  0xe1   :  { %1008 = dma.vmem_to_hbm [thread:$0]  %s1006_s27, 128, %s2404_s2, [#allocation3]  }
  0xe2   :  { %1362 = dma.done.wait [#allocation3], 128  }
  0xe3   :  { %1363 = vsyncadd [#allocation3], 4294967168 }
  0xe4   :  { %1012 = vsyncpa [#allocation3], 1 }
  0xe5   :  { %1013 = vsyncpa [#allocation4], 1 }

</bundles_post_ra>
